<compile_context>
chip_gen: v6e
topology: v6e:2x2x1
jax: 0.10.0
libtpu: 0.0.40
codegen_flags: <defaults>
</compile_context>

<pallas_src>
import jax
import jax.numpy as jnp
from jax.experimental import pallas as pl
from jax.experimental.pallas import tpu as pltpu

SRC_VOCAB = 50
TRG_VOCAB = 64
EMB = 32
HID = 32
VPAD = 128   # lane-dense padded output width (>= TRG_VOCAB, multiple of 128)


# ----------------------------- fused GRU step --------------------------------
def _gru_step(gx, h, whh, bhh, H):
    """One GRU update with pre-projected input gates.

    gx  : [B, 3H]  x @ Wih + b_ih (fused gates, order r,z,n, input bias folded)
    whh : [H, 3H]  fused hidden weights;  bhh : [1, 3H] fused hidden biases.
    Matches nn.GRU:  n = tanh(W_in x + b_in + r * (W_hn h + b_hn)).
    r and z share ONE sigmoid over the contiguous first 2H lanes to halve the
    EUP pushes on the serial per-step chain.
    """
    gh = jnp.dot(h, whh, preferred_element_type=jnp.float32) + bhh   # [B, 3H]
    rz = jax.nn.sigmoid(gx[:, :2 * H] + gh[:, :2 * H])               # [B, 2H]
    r = rz[:, :H]
    z = rz[:, H:2 * H]
    n = jnp.tanh(gx[:, 2 * H:] + r * gh[:, 2 * H:])
    return (1.0 - z) * n + z * h


# ------------------------------ fused kernel ---------------------------------
def seq2seq_kernel(src_ref, trg_ref, plen_ref,
                   eemb_ref, ewih_ref, ewhh_ref, ebih_ref, ebhh_ref,
                   demb_ref, dwih_ref, dwhh_ref, dbih_ref, dbhh_ref,
                   wout_ref, bout_ref,
                   out_ref, h_scr):
    # src_ref : [S*B, 1]      int32 time-major source token ids
    # trg_ref : [(T-1)*B, 1]  int32 time-major target token ids (tokens 0..T-2)
    # plen_ref: [B, 1]        int32 source padding lengths
    # out_ref : [T*B, VPAD]   f32 logits slab (rows 0..B-1 are zeros)
    # h_scr   : [(T-1)*B, H]  f32 VMEM scratch for decoder hiddens
    TB, VP = out_ref.shape
    H = ewhh_ref.shape[0]
    B = plen_ref.shape[0]
    S = src_ref.shape[0] // B
    Tm1 = trg_ref.shape[0] // B

    plen = plen_ref[...]                                   # [B, 1] int32

    # ---------------- encoder ----------------
    # Embedding lookup fused with the hoisted input projection:
    #   gx = onehot(src) @ (emb @ Wih) + b_ih     (two tiny MXU matmuls,
    # both off the serial critical path; exact for 0/1 selectors).
    src_vocab = eemb_ref.shape[0]
    src_oh = (src_ref[...] ==
              jax.lax.broadcasted_iota(jnp.int32, (S * B, src_vocab), 1)
              ).astype(jnp.float32)                        # [S*B, Vsrc]
    eproj = jnp.dot(eemb_ref[...], ewih_ref[...],
                    preferred_element_type=jnp.float32)    # [Vsrc, 3H]
    gx = jnp.dot(src_oh, eproj,
                 preferred_element_type=jnp.float32) + ebih_ref[...]  # [S*B, 3H]

    ewhh = ewhh_ref[...]
    ebhh = ebhh_ref[...]

    h = jnp.zeros((B, H), jnp.float32)
    for t in range(S):                                     # fully unrolled
        lo = t * B
        h_new = _gru_step(gx[lo:lo + B], h, ewhh, ebhh, H)
        # freeze the hidden state past each sequence's padding_len
        h = jnp.where(plen > t, h_new, h)

    # ---------------- decoder ----------------
    trg_vocab = demb_ref.shape[0]
    trg_oh = (trg_ref[...] ==
              jax.lax.broadcasted_iota(jnp.int32, (Tm1 * B, trg_vocab), 1)
              ).astype(jnp.float32)                        # [(T-1)*B, Vtrg]
    dproj = jnp.dot(demb_ref[...], dwih_ref[...],
                    preferred_element_type=jnp.float32)    # [Vtrg, 3H]
    gy = jnp.dot(trg_oh, dproj,
                 preferred_element_type=jnp.float32) + dbih_ref[...]  # [(T-1)*B, 3H]

    dwhh = dwhh_ref[...]
    dbhh = dbhh_ref[...]

    for t in range(Tm1):                                   # fully unrolled
        lo = t * B
        h = _gru_step(gy[lo:lo + B], h, dwhh, dbhh, H)
        h_scr[lo:lo + B, :] = h                            # bound live ranges

    # Batched, lane-dense vocab projection + two direct 2-D slab stores.
    logits = jnp.dot(h_scr[...], wout_ref[...],
                     preferred_element_type=jnp.float32) + bout_ref[...]  # [(T-1)*B, VPAD]
    out_ref[0:B, :] = jnp.zeros((B, VP), jnp.float32)
    out_ref[B:TB, :] = logits


# ------------------------------- parameters ----------------------------------
def init_params(key):
    ks = jax.random.split(key, 12)
    s = 0.1
    return {
        "enc_emb": s * jax.random.normal(ks[0], (SRC_VOCAB, EMB), jnp.float32),
        "enc_wih": s * jax.random.normal(ks[1], (3, EMB, HID), jnp.float32),
        "enc_whh": s * jax.random.normal(ks[2], (3, HID, HID), jnp.float32),
        "enc_bih": s * jax.random.normal(ks[3], (3, 1, HID), jnp.float32),
        "enc_bhh": s * jax.random.normal(ks[4], (3, 1, HID), jnp.float32),
        "dec_emb": s * jax.random.normal(ks[5], (TRG_VOCAB, EMB), jnp.float32),
        "dec_wih": s * jax.random.normal(ks[6], (3, EMB, HID), jnp.float32),
        "dec_whh": s * jax.random.normal(ks[7], (3, HID, HID), jnp.float32),
        "dec_bih": s * jax.random.normal(ks[8], (3, 1, HID), jnp.float32),
        "dec_bhh": s * jax.random.normal(ks[9], (3, 1, HID), jnp.float32),
        "dec_wout": s * jax.random.normal(ks[10], (HID, TRG_VOCAB), jnp.float32),
        "dec_bout": s * jax.random.normal(ks[11], (1, TRG_VOCAB), jnp.float32),
    }


def _fuse_gates(w):
    """[3, in, H] per-gate (r,z,n) -> [in, 3H] fused, preserving gate order."""
    return jnp.concatenate([w[0], w[1], w[2]], axis=-1)


# --------------------------------- wrapper ------------------------------------
def seq2seq_forward(params, text, summary, padding_len):
    """text: [B, S] int32, summary: [B, T] int32, padding_len: [B] int32.
    Returns outputs [B, T, TRG_VOCAB] f32 (teacher_forcing_ratio = 1.0)."""
    B, S = text.shape
    T = summary.shape[1]

    # Only tiny int32 layout glue remains outside the kernel.
    src_ids = jnp.transpose(text.astype(jnp.int32)).reshape(S * B, 1)
    trg_ids = jnp.transpose(summary[:, :T - 1].astype(jnp.int32)).reshape((T - 1) * B, 1)
    plen = padding_len.astype(jnp.int32).reshape(B, 1)

    # fuse gate weights/biases: [3, in, H] -> [in, 3H] (gate order r, z, n)
    ewih = _fuse_gates(params["enc_wih"])
    ewhh = _fuse_gates(params["enc_whh"])
    ebih = _fuse_gates(params["enc_bih"])
    ebhh = _fuse_gates(params["enc_bhh"])
    dwih = _fuse_gates(params["dec_wih"])
    dwhh = _fuse_gates(params["dec_whh"])
    dbih = _fuse_gates(params["dec_bih"])
    dbhh = _fuse_gates(params["dec_bhh"])

    # lane-dense output: pad the vocab projection to 128 lanes (zeros 64..127)
    wout_p = jnp.pad(params["dec_wout"], ((0, 0), (0, VPAD - TRG_VOCAB)))
    bout_p = jnp.pad(params["dec_bout"], ((0, 0), (0, VPAD - TRG_VOCAB)))

    vmem = pl.BlockSpec(memory_space=pltpu.MemorySpace.VMEM)

    out2d = pl.pallas_call(
        seq2seq_kernel,
        out_shape=jax.ShapeDtypeStruct((T * B, VPAD), jnp.float32),
        in_specs=[vmem] * 15,
        out_specs=vmem,
        scratch_shapes=[pltpu.VMEM(((T - 1) * B, HID), jnp.float32)],
    )(src_ids, trg_ids, plen,
      params["enc_emb"], ewih, ewhh, ebih, ebhh,
      params["dec_emb"], dwih, dwhh, dbih, dbhh,
      wout_p, bout_p)

    out = out2d.reshape(T, B, VPAD)[:, :, :TRG_VOCAB]      # time-major -> slice pad
    return jnp.transpose(out, (1, 0, 2))                   # [B, T, V]


# ------------------ pure-JAX reference for correctness check -----------------
def _gru_cell_ref(x, h, wih, whh, bih, bhh):
    r = jax.nn.sigmoid(jnp.dot(x, wih[0]) + bih[0] + jnp.dot(h, whh[0]) + bhh[0])
    z = jax.nn.sigmoid(jnp.dot(x, wih[1]) + bih[1] + jnp.dot(h, whh[1]) + bhh[1])
    n = jnp.tanh(jnp.dot(x, wih[2]) + bih[2]
                 + r * (jnp.dot(h, whh[2]) + bhh[2]))
    return (1.0 - z) * n + z * h


def _ref_forward(params, text, summary, padding_len):
    B, S = text.shape
    T = summary.shape[1]
    x = jnp.take(params["enc_emb"], text, axis=0)                  # [B, S, E]
    h = jnp.zeros((B, HID), jnp.float32)
    for t in range(S):
        h_new = _gru_cell_ref(x[:, t], h, params["enc_wih"], params["enc_whh"],
                              params["enc_bih"], params["enc_bhh"])
        m = (t < padding_len)[:, None]
        h = jnp.where(m, h_new, h)
    y = jnp.take(params["dec_emb"], summary, axis=0)               # [B, T, E]
    outs = [jnp.zeros((B, TRG_VOCAB), jnp.float32)]
    for t in range(1, T):
        h = _gru_cell_ref(y[:, t - 1], h, params["dec_wih"], params["dec_whh"],
                          params["dec_bih"], params["dec_bhh"])
        outs.append(jnp.dot(h, params["dec_wout"]) + params["dec_bout"][0])
    return jnp.stack(outs, axis=1)


if __name__ == "__main__":
    key = jax.random.PRNGKey(0)
    kp, k1, k2, k3 = jax.random.split(key, 4)

    B, S, T = 8, 10, 6
    params = init_params(kp)
    text = jax.random.randint(k1, (B, S), 0, SRC_VOCAB, dtype=jnp.int32)
    summary = jax.random.randint(k2, (B, T), 0, TRG_VOCAB, dtype=jnp.int32)
    padding_len = jax.random.randint(k3, (B,), 3, S + 1, dtype=jnp.int32)

    out = jax.block_until_ready(
        jax.jit(seq2seq_forward)(params, text, summary, padding_len))
    ref = _ref_forward(params, text, summary, padding_len)

    assert out.shape == (B, T, TRG_VOCAB), out.shape
    assert jnp.allclose(out, ref, atol=1e-4, rtol=1e-4), \
        float(jnp.max(jnp.abs(out - ref)))
    print("KERNEL_OK")
</pallas_src>

<mosaic_0001>
module attributes {stable_mosaic.version = 11 : i64} {
  func.func @seq2seq_kernel(%arg0: memref<80x1xi32, #tpu.memory_space<vmem>>, %arg1: memref<40x1xi32, #tpu.memory_space<vmem>>, %arg2: memref<8x1xi32, #tpu.memory_space<vmem>>, %arg3: memref<50x32xf32, #tpu.memory_space<vmem>>, %arg4: memref<32x96xf32, #tpu.memory_space<vmem>>, %arg5: memref<32x96xf32, #tpu.memory_space<vmem>>, %arg6: memref<1x96xf32, #tpu.memory_space<vmem>>, %arg7: memref<1x96xf32, #tpu.memory_space<vmem>>, %arg8: memref<64x32xf32, #tpu.memory_space<vmem>>, %arg9: memref<32x96xf32, #tpu.memory_space<vmem>>, %arg10: memref<32x96xf32, #tpu.memory_space<vmem>>, %arg11: memref<1x96xf32, #tpu.memory_space<vmem>>, %arg12: memref<1x96xf32, #tpu.memory_space<vmem>>, %arg13: memref<32x128xf32, #tpu.memory_space<vmem>>, %arg14: memref<1x128xf32, #tpu.memory_space<vmem>>, %arg15: memref<48x128xf32, #tpu.memory_space<vmem>>, %arg16: memref<40x32xf32, #tpu.memory_space<vmem>>) attributes {dimension_semantics = [], scalar_prefetch = 0 : i64, scratch_operands = 1 : i64, tpu.core_type = #tpu.core_type<tc>} {
    %c0 = arith.constant 0 : index
    %c0_0 = arith.constant 0 : index
    %0 = vector.load %arg2[%c0, %c0_0] : memref<8x1xi32, #tpu.memory_space<vmem>>, vector<8x1xi32>
    %c0_1 = arith.constant 0 : index
    %c0_2 = arith.constant 0 : index
    %1 = vector.load %arg0[%c0_1, %c0_2] : memref<80x1xi32, #tpu.memory_space<vmem>>, vector<80x1xi32>
    %2 = tpu.iota {dimensions = array<i32: 1>} : vector<80x50xi32>
    %3 = vector.broadcast %1 : vector<80x1xi32> to vector<80x50xi32>
    %4 = arith.cmpi eq, %3, %2 : vector<80x50xi32>
    %5 = arith.extui %4 : vector<80x50xi1> to vector<80x50xi32>
    %6 = arith.sitofp %5 : vector<80x50xi32> to vector<80x50xf32>
    %c0_3 = arith.constant 0 : index
    %c0_4 = arith.constant 0 : index
    %7 = vector.load %arg3[%c0_3, %c0_4] : memref<50x32xf32, #tpu.memory_space<vmem>>, vector<50x32xf32>
    %c0_5 = arith.constant 0 : index
    %c0_6 = arith.constant 0 : index
    %8 = vector.load %arg4[%c0_5, %c0_6] : memref<32x96xf32, #tpu.memory_space<vmem>>, vector<32x96xf32>
    %cst = arith.constant dense<0.000000e+00> : vector<50x96xf32>
    %9 = tpu.matmul %7, %8, %cst {dimension_numbers = #tpu.dot_dimension_numbers<[1], [0], [0], [1], [0, 0, 1, 1], [], []>} : vector<50x32xf32>, vector<32x96xf32>, vector<50x96xf32> -> vector<50x96xf32>
    %cst_7 = arith.constant dense<0.000000e+00> : vector<80x96xf32>
    %10 = tpu.matmul %6, %9, %cst_7 {dimension_numbers = #tpu.dot_dimension_numbers<[1], [0], [0], [1], [0, 0, 1, 1], [], []>} : vector<80x50xf32>, vector<50x96xf32>, vector<80x96xf32> -> vector<80x96xf32>
    %c0_8 = arith.constant 0 : index
    %c0_9 = arith.constant 0 : index
    %11 = vector.load %arg6[%c0_8, %c0_9] : memref<1x96xf32, #tpu.memory_space<vmem>>, vector<1x96xf32>
    %12 = vector.broadcast %11 : vector<1x96xf32> to vector<80x96xf32>
    %13 = arith.addf %10, %12 : vector<80x96xf32>
    %c0_10 = arith.constant 0 : index
    %c0_11 = arith.constant 0 : index
    %14 = vector.load %arg5[%c0_10, %c0_11] : memref<32x96xf32, #tpu.memory_space<vmem>>, vector<32x96xf32>
    %c0_12 = arith.constant 0 : index
    %c0_13 = arith.constant 0 : index
    %15 = vector.load %arg7[%c0_12, %c0_13] : memref<1x96xf32, #tpu.memory_space<vmem>>, vector<1x96xf32>
    %cst_14 = arith.constant 0.000000e+00 : f32
    %16 = vector.broadcast %cst_14 : f32 to vector<8x32xf32>
    %17 = vector.extract_strided_slice %13 {offsets = [0, 0], sizes = [8, 96], strides = [1, 1]} : vector<80x96xf32> to vector<8x96xf32>
    %cst_15 = arith.constant dense<0.000000e+00> : vector<8x96xf32>
    %18 = tpu.matmul %16, %14, %cst_15 {dimension_numbers = #tpu.dot_dimension_numbers<[1], [0], [0], [1], [0, 0, 1, 1], [], []>} : vector<8x32xf32>, vector<32x96xf32>, vector<8x96xf32> -> vector<8x96xf32>
    %19 = vector.broadcast %15 : vector<1x96xf32> to vector<8x96xf32>
    %20 = arith.addf %18, %19 : vector<8x96xf32>
    %21 = vector.extract_strided_slice %17 {offsets = [0, 0], sizes = [8, 64], strides = [1, 1]} : vector<8x96xf32> to vector<8x64xf32>
    %22 = vector.extract_strided_slice %20 {offsets = [0, 0], sizes = [8, 64], strides = [1, 1]} : vector<8x96xf32> to vector<8x64xf32>
    %23 = arith.addf %21, %22 : vector<8x64xf32>
    %24 = arith.negf %23 : vector<8x64xf32>
    %25 = math.exp %24 : vector<8x64xf32>
    %cst_16 = arith.constant 1.000000e+00 : f32
    %26 = vector.broadcast %cst_16 : f32 to vector<8x64xf32>
    %27 = arith.addf %26, %25 : vector<8x64xf32>
    %28 = arith.divf %26, %27 : vector<8x64xf32>
    %29 = vector.extract_strided_slice %28 {offsets = [0, 0], sizes = [8, 32], strides = [1, 1]} : vector<8x64xf32> to vector<8x32xf32>
    %30 = vector.extract_strided_slice %28 {offsets = [0, 32], sizes = [8, 32], strides = [1, 1]} : vector<8x64xf32> to vector<8x32xf32>
    %31 = vector.extract_strided_slice %17 {offsets = [0, 64], sizes = [8, 32], strides = [1, 1]} : vector<8x96xf32> to vector<8x32xf32>
    %32 = vector.extract_strided_slice %20 {offsets = [0, 64], sizes = [8, 32], strides = [1, 1]} : vector<8x96xf32> to vector<8x32xf32>
    %33 = arith.mulf %29, %32 : vector<8x32xf32>
    %34 = arith.addf %31, %33 : vector<8x32xf32>
    %35 = math.tanh %34 : vector<8x32xf32>
    %cst_17 = arith.constant 1.000000e+00 : f32
    %36 = vector.broadcast %cst_17 : f32 to vector<8x32xf32>
    %37 = arith.subf %36, %30 : vector<8x32xf32>
    %38 = arith.mulf %37, %35 : vector<8x32xf32>
    %39 = arith.mulf %30, %16 : vector<8x32xf32>
    %40 = arith.addf %38, %39 : vector<8x32xf32>
    %c0_i32 = arith.constant 0 : i32
    %41 = vector.broadcast %c0_i32 : i32 to vector<8x1xi32>
    %42 = arith.cmpi sgt, %0, %41 : vector<8x1xi32>
    %43 = vector.shape_cast %42 : vector<8x1xi1> to vector<8x1xi1>
    %44 = vector.broadcast %43 : vector<8x1xi1> to vector<8x32xi1>
    %45 = arith.select %44, %40, %16 : vector<8x32xi1>, vector<8x32xf32>
    %46 = vector.extract_strided_slice %13 {offsets = [8, 0], sizes = [8, 96], strides = [1, 1]} : vector<80x96xf32> to vector<8x96xf32>
    %cst_18 = arith.constant dense<0.000000e+00> : vector<8x96xf32>
    %47 = tpu.matmul %45, %14, %cst_18 {dimension_numbers = #tpu.dot_dimension_numbers<[1], [0], [0], [1], [0, 0, 1, 1], [], []>} : vector<8x32xf32>, vector<32x96xf32>, vector<8x96xf32> -> vector<8x96xf32>
    %48 = vector.broadcast %15 : vector<1x96xf32> to vector<8x96xf32>
    %49 = arith.addf %47, %48 : vector<8x96xf32>
    %50 = vector.extract_strided_slice %46 {offsets = [0, 0], sizes = [8, 64], strides = [1, 1]} : vector<8x96xf32> to vector<8x64xf32>
    %51 = vector.extract_strided_slice %49 {offsets = [0, 0], sizes = [8, 64], strides = [1, 1]} : vector<8x96xf32> to vector<8x64xf32>
    %52 = arith.addf %50, %51 : vector<8x64xf32>
    %53 = arith.negf %52 : vector<8x64xf32>
    %54 = math.exp %53 : vector<8x64xf32>
    %cst_19 = arith.constant 1.000000e+00 : f32
    %55 = vector.broadcast %cst_19 : f32 to vector<8x64xf32>
    %56 = arith.addf %55, %54 : vector<8x64xf32>
    %57 = arith.divf %55, %56 : vector<8x64xf32>
    %58 = vector.extract_strided_slice %57 {offsets = [0, 0], sizes = [8, 32], strides = [1, 1]} : vector<8x64xf32> to vector<8x32xf32>
    %59 = vector.extract_strided_slice %57 {offsets = [0, 32], sizes = [8, 32], strides = [1, 1]} : vector<8x64xf32> to vector<8x32xf32>
    %60 = vector.extract_strided_slice %46 {offsets = [0, 64], sizes = [8, 32], strides = [1, 1]} : vector<8x96xf32> to vector<8x32xf32>
    %61 = vector.extract_strided_slice %49 {offsets = [0, 64], sizes = [8, 32], strides = [1, 1]} : vector<8x96xf32> to vector<8x32xf32>
    %62 = arith.mulf %58, %61 : vector<8x32xf32>
    %63 = arith.addf %60, %62 : vector<8x32xf32>
    %64 = math.tanh %63 : vector<8x32xf32>
    %cst_20 = arith.constant 1.000000e+00 : f32
    %65 = vector.broadcast %cst_20 : f32 to vector<8x32xf32>
    %66 = arith.subf %65, %59 : vector<8x32xf32>
    %67 = arith.mulf %66, %64 : vector<8x32xf32>
    %68 = arith.mulf %59, %45 : vector<8x32xf32>
    %69 = arith.addf %67, %68 : vector<8x32xf32>
    %c1_i32 = arith.constant 1 : i32
    %70 = vector.broadcast %c1_i32 : i32 to vector<8x1xi32>
    %71 = arith.cmpi sgt, %0, %70 : vector<8x1xi32>
    %72 = vector.shape_cast %71 : vector<8x1xi1> to vector<8x1xi1>
    %73 = vector.broadcast %72 : vector<8x1xi1> to vector<8x32xi1>
    %74 = arith.select %73, %69, %45 : vector<8x32xi1>, vector<8x32xf32>
    %75 = vector.extract_strided_slice %13 {offsets = [16, 0], sizes = [8, 96], strides = [1, 1]} : vector<80x96xf32> to vector<8x96xf32>
    %cst_21 = arith.constant dense<0.000000e+00> : vector<8x96xf32>
    %76 = tpu.matmul %74, %14, %cst_21 {dimension_numbers = #tpu.dot_dimension_numbers<[1], [0], [0], [1], [0, 0, 1, 1], [], []>} : vector<8x32xf32>, vector<32x96xf32>, vector<8x96xf32> -> vector<8x96xf32>
    %77 = vector.broadcast %15 : vector<1x96xf32> to vector<8x96xf32>
    %78 = arith.addf %76, %77 : vector<8x96xf32>
    %79 = vector.extract_strided_slice %75 {offsets = [0, 0], sizes = [8, 64], strides = [1, 1]} : vector<8x96xf32> to vector<8x64xf32>
    %80 = vector.extract_strided_slice %78 {offsets = [0, 0], sizes = [8, 64], strides = [1, 1]} : vector<8x96xf32> to vector<8x64xf32>
    %81 = arith.addf %79, %80 : vector<8x64xf32>
    %82 = arith.negf %81 : vector<8x64xf32>
    %83 = math.exp %82 : vector<8x64xf32>
    %cst_22 = arith.constant 1.000000e+00 : f32
    %84 = vector.broadcast %cst_22 : f32 to vector<8x64xf32>
    %85 = arith.addf %84, %83 : vector<8x64xf32>
    %86 = arith.divf %84, %85 : vector<8x64xf32>
    %87 = vector.extract_strided_slice %86 {offsets = [0, 0], sizes = [8, 32], strides = [1, 1]} : vector<8x64xf32> to vector<8x32xf32>
    %88 = vector.extract_strided_slice %86 {offsets = [0, 32], sizes = [8, 32], strides = [1, 1]} : vector<8x64xf32> to vector<8x32xf32>
    %89 = vector.extract_strided_slice %75 {offsets = [0, 64], sizes = [8, 32], strides = [1, 1]} : vector<8x96xf32> to vector<8x32xf32>
    %90 = vector.extract_strided_slice %78 {offsets = [0, 64], sizes = [8, 32], strides = [1, 1]} : vector<8x96xf32> to vector<8x32xf32>
    %91 = arith.mulf %87, %90 : vector<8x32xf32>
    %92 = arith.addf %89, %91 : vector<8x32xf32>
    %93 = math.tanh %92 : vector<8x32xf32>
    %cst_23 = arith.constant 1.000000e+00 : f32
    %94 = vector.broadcast %cst_23 : f32 to vector<8x32xf32>
    %95 = arith.subf %94, %88 : vector<8x32xf32>
    %96 = arith.mulf %95, %93 : vector<8x32xf32>
    %97 = arith.mulf %88, %74 : vector<8x32xf32>
    %98 = arith.addf %96, %97 : vector<8x32xf32>
    %c2_i32 = arith.constant 2 : i32
    %99 = vector.broadcast %c2_i32 : i32 to vector<8x1xi32>
    %100 = arith.cmpi sgt, %0, %99 : vector<8x1xi32>
    %101 = vector.shape_cast %100 : vector<8x1xi1> to vector<8x1xi1>
    %102 = vector.broadcast %101 : vector<8x1xi1> to vector<8x32xi1>
    %103 = arith.select %102, %98, %74 : vector<8x32xi1>, vector<8x32xf32>
    %104 = vector.extract_strided_slice %13 {offsets = [24, 0], sizes = [8, 96], strides = [1, 1]} : vector<80x96xf32> to vector<8x96xf32>
    %cst_24 = arith.constant dense<0.000000e+00> : vector<8x96xf32>
    %105 = tpu.matmul %103, %14, %cst_24 {dimension_numbers = #tpu.dot_dimension_numbers<[1], [0], [0], [1], [0, 0, 1, 1], [], []>} : vector<8x32xf32>, vector<32x96xf32>, vector<8x96xf32> -> vector<8x96xf32>
    %106 = vector.broadcast %15 : vector<1x96xf32> to vector<8x96xf32>
    %107 = arith.addf %105, %106 : vector<8x96xf32>
    %108 = vector.extract_strided_slice %104 {offsets = [0, 0], sizes = [8, 64], strides = [1, 1]} : vector<8x96xf32> to vector<8x64xf32>
    %109 = vector.extract_strided_slice %107 {offsets = [0, 0], sizes = [8, 64], strides = [1, 1]} : vector<8x96xf32> to vector<8x64xf32>
    %110 = arith.addf %108, %109 : vector<8x64xf32>
    %111 = arith.negf %110 : vector<8x64xf32>
    %112 = math.exp %111 : vector<8x64xf32>
    %cst_25 = arith.constant 1.000000e+00 : f32
    %113 = vector.broadcast %cst_25 : f32 to vector<8x64xf32>
    %114 = arith.addf %113, %112 : vector<8x64xf32>
    %115 = arith.divf %113, %114 : vector<8x64xf32>
    %116 = vector.extract_strided_slice %115 {offsets = [0, 0], sizes = [8, 32], strides = [1, 1]} : vector<8x64xf32> to vector<8x32xf32>
    %117 = vector.extract_strided_slice %115 {offsets = [0, 32], sizes = [8, 32], strides = [1, 1]} : vector<8x64xf32> to vector<8x32xf32>
    %118 = vector.extract_strided_slice %104 {offsets = [0, 64], sizes = [8, 32], strides = [1, 1]} : vector<8x96xf32> to vector<8x32xf32>
    %119 = vector.extract_strided_slice %107 {offsets = [0, 64], sizes = [8, 32], strides = [1, 1]} : vector<8x96xf32> to vector<8x32xf32>
    %120 = arith.mulf %116, %119 : vector<8x32xf32>
    %121 = arith.addf %118, %120 : vector<8x32xf32>
    %122 = math.tanh %121 : vector<8x32xf32>
    %cst_26 = arith.constant 1.000000e+00 : f32
    %123 = vector.broadcast %cst_26 : f32 to vector<8x32xf32>
    %124 = arith.subf %123, %117 : vector<8x32xf32>
    %125 = arith.mulf %124, %122 : vector<8x32xf32>
    %126 = arith.mulf %117, %103 : vector<8x32xf32>
    %127 = arith.addf %125, %126 : vector<8x32xf32>
    %c3_i32 = arith.constant 3 : i32
    %128 = vector.broadcast %c3_i32 : i32 to vector<8x1xi32>
    %129 = arith.cmpi sgt, %0, %128 : vector<8x1xi32>
    %130 = vector.shape_cast %129 : vector<8x1xi1> to vector<8x1xi1>
    %131 = vector.broadcast %130 : vector<8x1xi1> to vector<8x32xi1>
    %132 = arith.select %131, %127, %103 : vector<8x32xi1>, vector<8x32xf32>
    %133 = vector.extract_strided_slice %13 {offsets = [32, 0], sizes = [8, 96], strides = [1, 1]} : vector<80x96xf32> to vector<8x96xf32>
    %cst_27 = arith.constant dense<0.000000e+00> : vector<8x96xf32>
    %134 = tpu.matmul %132, %14, %cst_27 {dimension_numbers = #tpu.dot_dimension_numbers<[1], [0], [0], [1], [0, 0, 1, 1], [], []>} : vector<8x32xf32>, vector<32x96xf32>, vector<8x96xf32> -> vector<8x96xf32>
    %135 = vector.broadcast %15 : vector<1x96xf32> to vector<8x96xf32>
    %136 = arith.addf %134, %135 : vector<8x96xf32>
    %137 = vector.extract_strided_slice %133 {offsets = [0, 0], sizes = [8, 64], strides = [1, 1]} : vector<8x96xf32> to vector<8x64xf32>
    %138 = vector.extract_strided_slice %136 {offsets = [0, 0], sizes = [8, 64], strides = [1, 1]} : vector<8x96xf32> to vector<8x64xf32>
    %139 = arith.addf %137, %138 : vector<8x64xf32>
    %140 = arith.negf %139 : vector<8x64xf32>
    %141 = math.exp %140 : vector<8x64xf32>
    %cst_28 = arith.constant 1.000000e+00 : f32
    %142 = vector.broadcast %cst_28 : f32 to vector<8x64xf32>
    %143 = arith.addf %142, %141 : vector<8x64xf32>
    %144 = arith.divf %142, %143 : vector<8x64xf32>
    %145 = vector.extract_strided_slice %144 {offsets = [0, 0], sizes = [8, 32], strides = [1, 1]} : vector<8x64xf32> to vector<8x32xf32>
    %146 = vector.extract_strided_slice %144 {offsets = [0, 32], sizes = [8, 32], strides = [1, 1]} : vector<8x64xf32> to vector<8x32xf32>
    %147 = vector.extract_strided_slice %133 {offsets = [0, 64], sizes = [8, 32], strides = [1, 1]} : vector<8x96xf32> to vector<8x32xf32>
    %148 = vector.extract_strided_slice %136 {offsets = [0, 64], sizes = [8, 32], strides = [1, 1]} : vector<8x96xf32> to vector<8x32xf32>
    %149 = arith.mulf %145, %148 : vector<8x32xf32>
    %150 = arith.addf %147, %149 : vector<8x32xf32>
    %151 = math.tanh %150 : vector<8x32xf32>
    %cst_29 = arith.constant 1.000000e+00 : f32
    %152 = vector.broadcast %cst_29 : f32 to vector<8x32xf32>
    %153 = arith.subf %152, %146 : vector<8x32xf32>
    %154 = arith.mulf %153, %151 : vector<8x32xf32>
    %155 = arith.mulf %146, %132 : vector<8x32xf32>
    %156 = arith.addf %154, %155 : vector<8x32xf32>
    %c4_i32 = arith.constant 4 : i32
    %157 = vector.broadcast %c4_i32 : i32 to vector<8x1xi32>
    %158 = arith.cmpi sgt, %0, %157 : vector<8x1xi32>
    %159 = vector.shape_cast %158 : vector<8x1xi1> to vector<8x1xi1>
    %160 = vector.broadcast %159 : vector<8x1xi1> to vector<8x32xi1>
    %161 = arith.select %160, %156, %132 : vector<8x32xi1>, vector<8x32xf32>
    %162 = vector.extract_strided_slice %13 {offsets = [40, 0], sizes = [8, 96], strides = [1, 1]} : vector<80x96xf32> to vector<8x96xf32>
    %cst_30 = arith.constant dense<0.000000e+00> : vector<8x96xf32>
    %163 = tpu.matmul %161, %14, %cst_30 {dimension_numbers = #tpu.dot_dimension_numbers<[1], [0], [0], [1], [0, 0, 1, 1], [], []>} : vector<8x32xf32>, vector<32x96xf32>, vector<8x96xf32> -> vector<8x96xf32>
    %164 = vector.broadcast %15 : vector<1x96xf32> to vector<8x96xf32>
    %165 = arith.addf %163, %164 : vector<8x96xf32>
    %166 = vector.extract_strided_slice %162 {offsets = [0, 0], sizes = [8, 64], strides = [1, 1]} : vector<8x96xf32> to vector<8x64xf32>
    %167 = vector.extract_strided_slice %165 {offsets = [0, 0], sizes = [8, 64], strides = [1, 1]} : vector<8x96xf32> to vector<8x64xf32>
    %168 = arith.addf %166, %167 : vector<8x64xf32>
    %169 = arith.negf %168 : vector<8x64xf32>
    %170 = math.exp %169 : vector<8x64xf32>
    %cst_31 = arith.constant 1.000000e+00 : f32
    %171 = vector.broadcast %cst_31 : f32 to vector<8x64xf32>
    %172 = arith.addf %171, %170 : vector<8x64xf32>
    %173 = arith.divf %171, %172 : vector<8x64xf32>
    %174 = vector.extract_strided_slice %173 {offsets = [0, 0], sizes = [8, 32], strides = [1, 1]} : vector<8x64xf32> to vector<8x32xf32>
    %175 = vector.extract_strided_slice %173 {offsets = [0, 32], sizes = [8, 32], strides = [1, 1]} : vector<8x64xf32> to vector<8x32xf32>
    %176 = vector.extract_strided_slice %162 {offsets = [0, 64], sizes = [8, 32], strides = [1, 1]} : vector<8x96xf32> to vector<8x32xf32>
    %177 = vector.extract_strided_slice %165 {offsets = [0, 64], sizes = [8, 32], strides = [1, 1]} : vector<8x96xf32> to vector<8x32xf32>
    %178 = arith.mulf %174, %177 : vector<8x32xf32>
    %179 = arith.addf %176, %178 : vector<8x32xf32>
    %180 = math.tanh %179 : vector<8x32xf32>
    %cst_32 = arith.constant 1.000000e+00 : f32
    %181 = vector.broadcast %cst_32 : f32 to vector<8x32xf32>
    %182 = arith.subf %181, %175 : vector<8x32xf32>
    %183 = arith.mulf %182, %180 : vector<8x32xf32>
    %184 = arith.mulf %175, %161 : vector<8x32xf32>
    %185 = arith.addf %183, %184 : vector<8x32xf32>
    %c5_i32 = arith.constant 5 : i32
    %186 = vector.broadcast %c5_i32 : i32 to vector<8x1xi32>
    %187 = arith.cmpi sgt, %0, %186 : vector<8x1xi32>
    %188 = vector.shape_cast %187 : vector<8x1xi1> to vector<8x1xi1>
    %189 = vector.broadcast %188 : vector<8x1xi1> to vector<8x32xi1>
    %190 = arith.select %189, %185, %161 : vector<8x32xi1>, vector<8x32xf32>
    %191 = vector.extract_strided_slice %13 {offsets = [48, 0], sizes = [8, 96], strides = [1, 1]} : vector<80x96xf32> to vector<8x96xf32>
    %cst_33 = arith.constant dense<0.000000e+00> : vector<8x96xf32>
    %192 = tpu.matmul %190, %14, %cst_33 {dimension_numbers = #tpu.dot_dimension_numbers<[1], [0], [0], [1], [0, 0, 1, 1], [], []>} : vector<8x32xf32>, vector<32x96xf32>, vector<8x96xf32> -> vector<8x96xf32>
    %193 = vector.broadcast %15 : vector<1x96xf32> to vector<8x96xf32>
    %194 = arith.addf %192, %193 : vector<8x96xf32>
    %195 = vector.extract_strided_slice %191 {offsets = [0, 0], sizes = [8, 64], strides = [1, 1]} : vector<8x96xf32> to vector<8x64xf32>
    %196 = vector.extract_strided_slice %194 {offsets = [0, 0], sizes = [8, 64], strides = [1, 1]} : vector<8x96xf32> to vector<8x64xf32>
    %197 = arith.addf %195, %196 : vector<8x64xf32>
    %198 = arith.negf %197 : vector<8x64xf32>
    %199 = math.exp %198 : vector<8x64xf32>
    %cst_34 = arith.constant 1.000000e+00 : f32
    %200 = vector.broadcast %cst_34 : f32 to vector<8x64xf32>
    %201 = arith.addf %200, %199 : vector<8x64xf32>
    %202 = arith.divf %200, %201 : vector<8x64xf32>
    %203 = vector.extract_strided_slice %202 {offsets = [0, 0], sizes = [8, 32], strides = [1, 1]} : vector<8x64xf32> to vector<8x32xf32>
    %204 = vector.extract_strided_slice %202 {offsets = [0, 32], sizes = [8, 32], strides = [1, 1]} : vector<8x64xf32> to vector<8x32xf32>
    %205 = vector.extract_strided_slice %191 {offsets = [0, 64], sizes = [8, 32], strides = [1, 1]} : vector<8x96xf32> to vector<8x32xf32>
    %206 = vector.extract_strided_slice %194 {offsets = [0, 64], sizes = [8, 32], strides = [1, 1]} : vector<8x96xf32> to vector<8x32xf32>
    %207 = arith.mulf %203, %206 : vector<8x32xf32>
    %208 = arith.addf %205, %207 : vector<8x32xf32>
    %209 = math.tanh %208 : vector<8x32xf32>
    %cst_35 = arith.constant 1.000000e+00 : f32
    %210 = vector.broadcast %cst_35 : f32 to vector<8x32xf32>
    %211 = arith.subf %210, %204 : vector<8x32xf32>
    %212 = arith.mulf %211, %209 : vector<8x32xf32>
    %213 = arith.mulf %204, %190 : vector<8x32xf32>
    %214 = arith.addf %212, %213 : vector<8x32xf32>
    %c6_i32 = arith.constant 6 : i32
    %215 = vector.broadcast %c6_i32 : i32 to vector<8x1xi32>
    %216 = arith.cmpi sgt, %0, %215 : vector<8x1xi32>
    %217 = vector.shape_cast %216 : vector<8x1xi1> to vector<8x1xi1>
    %218 = vector.broadcast %217 : vector<8x1xi1> to vector<8x32xi1>
    %219 = arith.select %218, %214, %190 : vector<8x32xi1>, vector<8x32xf32>
    %220 = vector.extract_strided_slice %13 {offsets = [56, 0], sizes = [8, 96], strides = [1, 1]} : vector<80x96xf32> to vector<8x96xf32>
    %cst_36 = arith.constant dense<0.000000e+00> : vector<8x96xf32>
    %221 = tpu.matmul %219, %14, %cst_36 {dimension_numbers = #tpu.dot_dimension_numbers<[1], [0], [0], [1], [0, 0, 1, 1], [], []>} : vector<8x32xf32>, vector<32x96xf32>, vector<8x96xf32> -> vector<8x96xf32>
    %222 = vector.broadcast %15 : vector<1x96xf32> to vector<8x96xf32>
    %223 = arith.addf %221, %222 : vector<8x96xf32>
    %224 = vector.extract_strided_slice %220 {offsets = [0, 0], sizes = [8, 64], strides = [1, 1]} : vector<8x96xf32> to vector<8x64xf32>
    %225 = vector.extract_strided_slice %223 {offsets = [0, 0], sizes = [8, 64], strides = [1, 1]} : vector<8x96xf32> to vector<8x64xf32>
    %226 = arith.addf %224, %225 : vector<8x64xf32>
    %227 = arith.negf %226 : vector<8x64xf32>
    %228 = math.exp %227 : vector<8x64xf32>
    %cst_37 = arith.constant 1.000000e+00 : f32
    %229 = vector.broadcast %cst_37 : f32 to vector<8x64xf32>
    %230 = arith.addf %229, %228 : vector<8x64xf32>
    %231 = arith.divf %229, %230 : vector<8x64xf32>
    %232 = vector.extract_strided_slice %231 {offsets = [0, 0], sizes = [8, 32], strides = [1, 1]} : vector<8x64xf32> to vector<8x32xf32>
    %233 = vector.extract_strided_slice %231 {offsets = [0, 32], sizes = [8, 32], strides = [1, 1]} : vector<8x64xf32> to vector<8x32xf32>
    %234 = vector.extract_strided_slice %220 {offsets = [0, 64], sizes = [8, 32], strides = [1, 1]} : vector<8x96xf32> to vector<8x32xf32>
    %235 = vector.extract_strided_slice %223 {offsets = [0, 64], sizes = [8, 32], strides = [1, 1]} : vector<8x96xf32> to vector<8x32xf32>
    %236 = arith.mulf %232, %235 : vector<8x32xf32>
    %237 = arith.addf %234, %236 : vector<8x32xf32>
    %238 = math.tanh %237 : vector<8x32xf32>
    %cst_38 = arith.constant 1.000000e+00 : f32
    %239 = vector.broadcast %cst_38 : f32 to vector<8x32xf32>
    %240 = arith.subf %239, %233 : vector<8x32xf32>
    %241 = arith.mulf %240, %238 : vector<8x32xf32>
    %242 = arith.mulf %233, %219 : vector<8x32xf32>
    %243 = arith.addf %241, %242 : vector<8x32xf32>
    %c7_i32 = arith.constant 7 : i32
    %244 = vector.broadcast %c7_i32 : i32 to vector<8x1xi32>
    %245 = arith.cmpi sgt, %0, %244 : vector<8x1xi32>
    %246 = vector.shape_cast %245 : vector<8x1xi1> to vector<8x1xi1>
    %247 = vector.broadcast %246 : vector<8x1xi1> to vector<8x32xi1>
    %248 = arith.select %247, %243, %219 : vector<8x32xi1>, vector<8x32xf32>
    %249 = vector.extract_strided_slice %13 {offsets = [64, 0], sizes = [8, 96], strides = [1, 1]} : vector<80x96xf32> to vector<8x96xf32>
    %cst_39 = arith.constant dense<0.000000e+00> : vector<8x96xf32>
    %250 = tpu.matmul %248, %14, %cst_39 {dimension_numbers = #tpu.dot_dimension_numbers<[1], [0], [0], [1], [0, 0, 1, 1], [], []>} : vector<8x32xf32>, vector<32x96xf32>, vector<8x96xf32> -> vector<8x96xf32>
    %251 = vector.broadcast %15 : vector<1x96xf32> to vector<8x96xf32>
    %252 = arith.addf %250, %251 : vector<8x96xf32>
    %253 = vector.extract_strided_slice %249 {offsets = [0, 0], sizes = [8, 64], strides = [1, 1]} : vector<8x96xf32> to vector<8x64xf32>
    %254 = vector.extract_strided_slice %252 {offsets = [0, 0], sizes = [8, 64], strides = [1, 1]} : vector<8x96xf32> to vector<8x64xf32>
    %255 = arith.addf %253, %254 : vector<8x64xf32>
    %256 = arith.negf %255 : vector<8x64xf32>
    %257 = math.exp %256 : vector<8x64xf32>
    %cst_40 = arith.constant 1.000000e+00 : f32
    %258 = vector.broadcast %cst_40 : f32 to vector<8x64xf32>
    %259 = arith.addf %258, %257 : vector<8x64xf32>
    %260 = arith.divf %258, %259 : vector<8x64xf32>
    %261 = vector.extract_strided_slice %260 {offsets = [0, 0], sizes = [8, 32], strides = [1, 1]} : vector<8x64xf32> to vector<8x32xf32>
    %262 = vector.extract_strided_slice %260 {offsets = [0, 32], sizes = [8, 32], strides = [1, 1]} : vector<8x64xf32> to vector<8x32xf32>
    %263 = vector.extract_strided_slice %249 {offsets = [0, 64], sizes = [8, 32], strides = [1, 1]} : vector<8x96xf32> to vector<8x32xf32>
    %264 = vector.extract_strided_slice %252 {offsets = [0, 64], sizes = [8, 32], strides = [1, 1]} : vector<8x96xf32> to vector<8x32xf32>
    %265 = arith.mulf %261, %264 : vector<8x32xf32>
    %266 = arith.addf %263, %265 : vector<8x32xf32>
    %267 = math.tanh %266 : vector<8x32xf32>
    %cst_41 = arith.constant 1.000000e+00 : f32
    %268 = vector.broadcast %cst_41 : f32 to vector<8x32xf32>
    %269 = arith.subf %268, %262 : vector<8x32xf32>
    %270 = arith.mulf %269, %267 : vector<8x32xf32>
    %271 = arith.mulf %262, %248 : vector<8x32xf32>
    %272 = arith.addf %270, %271 : vector<8x32xf32>
    %c8_i32 = arith.constant 8 : i32
    %273 = vector.broadcast %c8_i32 : i32 to vector<8x1xi32>
    %274 = arith.cmpi sgt, %0, %273 : vector<8x1xi32>
    %275 = vector.shape_cast %274 : vector<8x1xi1> to vector<8x1xi1>
    %276 = vector.broadcast %275 : vector<8x1xi1> to vector<8x32xi1>
    %277 = arith.select %276, %272, %248 : vector<8x32xi1>, vector<8x32xf32>
    %278 = vector.extract_strided_slice %13 {offsets = [72, 0], sizes = [8, 96], strides = [1, 1]} : vector<80x96xf32> to vector<8x96xf32>
    %cst_42 = arith.constant dense<0.000000e+00> : vector<8x96xf32>
    %279 = tpu.matmul %277, %14, %cst_42 {dimension_numbers = #tpu.dot_dimension_numbers<[1], [0], [0], [1], [0, 0, 1, 1], [], []>} : vector<8x32xf32>, vector<32x96xf32>, vector<8x96xf32> -> vector<8x96xf32>
    %280 = vector.broadcast %15 : vector<1x96xf32> to vector<8x96xf32>
    %281 = arith.addf %279, %280 : vector<8x96xf32>
    %282 = vector.extract_strided_slice %278 {offsets = [0, 0], sizes = [8, 64], strides = [1, 1]} : vector<8x96xf32> to vector<8x64xf32>
    %283 = vector.extract_strided_slice %281 {offsets = [0, 0], sizes = [8, 64], strides = [1, 1]} : vector<8x96xf32> to vector<8x64xf32>
    %284 = arith.addf %282, %283 : vector<8x64xf32>
    %285 = arith.negf %284 : vector<8x64xf32>
    %286 = math.exp %285 : vector<8x64xf32>
    %cst_43 = arith.constant 1.000000e+00 : f32
    %287 = vector.broadcast %cst_43 : f32 to vector<8x64xf32>
    %288 = arith.addf %287, %286 : vector<8x64xf32>
    %289 = arith.divf %287, %288 : vector<8x64xf32>
    %290 = vector.extract_strided_slice %289 {offsets = [0, 0], sizes = [8, 32], strides = [1, 1]} : vector<8x64xf32> to vector<8x32xf32>
    %291 = vector.extract_strided_slice %289 {offsets = [0, 32], sizes = [8, 32], strides = [1, 1]} : vector<8x64xf32> to vector<8x32xf32>
    %292 = vector.extract_strided_slice %278 {offsets = [0, 64], sizes = [8, 32], strides = [1, 1]} : vector<8x96xf32> to vector<8x32xf32>
    %293 = vector.extract_strided_slice %281 {offsets = [0, 64], sizes = [8, 32], strides = [1, 1]} : vector<8x96xf32> to vector<8x32xf32>
    %294 = arith.mulf %290, %293 : vector<8x32xf32>
    %295 = arith.addf %292, %294 : vector<8x32xf32>
    %296 = math.tanh %295 : vector<8x32xf32>
    %cst_44 = arith.constant 1.000000e+00 : f32
    %297 = vector.broadcast %cst_44 : f32 to vector<8x32xf32>
    %298 = arith.subf %297, %291 : vector<8x32xf32>
    %299 = arith.mulf %298, %296 : vector<8x32xf32>
    %300 = arith.mulf %291, %277 : vector<8x32xf32>
    %301 = arith.addf %299, %300 : vector<8x32xf32>
    %c9_i32 = arith.constant 9 : i32
    %302 = vector.broadcast %c9_i32 : i32 to vector<8x1xi32>
    %303 = arith.cmpi sgt, %0, %302 : vector<8x1xi32>
    %304 = vector.shape_cast %303 : vector<8x1xi1> to vector<8x1xi1>
    %305 = vector.broadcast %304 : vector<8x1xi1> to vector<8x32xi1>
    %306 = arith.select %305, %301, %277 : vector<8x32xi1>, vector<8x32xf32>
    %c0_45 = arith.constant 0 : index
    %c0_46 = arith.constant 0 : index
    %307 = vector.load %arg1[%c0_45, %c0_46] : memref<40x1xi32, #tpu.memory_space<vmem>>, vector<40x1xi32>
    %308 = tpu.iota {dimensions = array<i32: 1>} : vector<40x64xi32>
    %309 = vector.broadcast %307 : vector<40x1xi32> to vector<40x64xi32>
    %310 = arith.cmpi eq, %309, %308 : vector<40x64xi32>
    %311 = arith.extui %310 : vector<40x64xi1> to vector<40x64xi32>
    %312 = arith.sitofp %311 : vector<40x64xi32> to vector<40x64xf32>
    %c0_47 = arith.constant 0 : index
    %c0_48 = arith.constant 0 : index
    %313 = vector.load %arg8[%c0_47, %c0_48] : memref<64x32xf32, #tpu.memory_space<vmem>>, vector<64x32xf32>
    %c0_49 = arith.constant 0 : index
    %c0_50 = arith.constant 0 : index
    %314 = vector.load %arg9[%c0_49, %c0_50] : memref<32x96xf32, #tpu.memory_space<vmem>>, vector<32x96xf32>
    %cst_51 = arith.constant dense<0.000000e+00> : vector<64x96xf32>
    %315 = tpu.matmul %313, %314, %cst_51 {dimension_numbers = #tpu.dot_dimension_numbers<[1], [0], [0], [1], [0, 0, 1, 1], [], []>} : vector<64x32xf32>, vector<32x96xf32>, vector<64x96xf32> -> vector<64x96xf32>
    %cst_52 = arith.constant dense<0.000000e+00> : vector<40x96xf32>
    %316 = tpu.matmul %312, %315, %cst_52 {dimension_numbers = #tpu.dot_dimension_numbers<[1], [0], [0], [1], [0, 0, 1, 1], [], []>} : vector<40x64xf32>, vector<64x96xf32>, vector<40x96xf32> -> vector<40x96xf32>
    %c0_53 = arith.constant 0 : index
    %c0_54 = arith.constant 0 : index
    %317 = vector.load %arg11[%c0_53, %c0_54] : memref<1x96xf32, #tpu.memory_space<vmem>>, vector<1x96xf32>
    %318 = vector.broadcast %317 : vector<1x96xf32> to vector<40x96xf32>
    %319 = arith.addf %316, %318 : vector<40x96xf32>
    %c0_55 = arith.constant 0 : index
    %c0_56 = arith.constant 0 : index
    %320 = vector.load %arg10[%c0_55, %c0_56] : memref<32x96xf32, #tpu.memory_space<vmem>>, vector<32x96xf32>
    %c0_57 = arith.constant 0 : index
    %c0_58 = arith.constant 0 : index
    %321 = vector.load %arg12[%c0_57, %c0_58] : memref<1x96xf32, #tpu.memory_space<vmem>>, vector<1x96xf32>
    %322 = vector.extract_strided_slice %319 {offsets = [0, 0], sizes = [8, 96], strides = [1, 1]} : vector<40x96xf32> to vector<8x96xf32>
    %cst_59 = arith.constant dense<0.000000e+00> : vector<8x96xf32>
    %323 = tpu.matmul %306, %320, %cst_59 {dimension_numbers = #tpu.dot_dimension_numbers<[1], [0], [0], [1], [0, 0, 1, 1], [], []>} : vector<8x32xf32>, vector<32x96xf32>, vector<8x96xf32> -> vector<8x96xf32>
    %324 = vector.broadcast %321 : vector<1x96xf32> to vector<8x96xf32>
    %325 = arith.addf %323, %324 : vector<8x96xf32>
    %326 = vector.extract_strided_slice %322 {offsets = [0, 0], sizes = [8, 64], strides = [1, 1]} : vector<8x96xf32> to vector<8x64xf32>
    %327 = vector.extract_strided_slice %325 {offsets = [0, 0], sizes = [8, 64], strides = [1, 1]} : vector<8x96xf32> to vector<8x64xf32>
    %328 = arith.addf %326, %327 : vector<8x64xf32>
    %329 = arith.negf %328 : vector<8x64xf32>
    %330 = math.exp %329 : vector<8x64xf32>
    %cst_60 = arith.constant 1.000000e+00 : f32
    %331 = vector.broadcast %cst_60 : f32 to vector<8x64xf32>
    %332 = arith.addf %331, %330 : vector<8x64xf32>
    %333 = arith.divf %331, %332 : vector<8x64xf32>
    %334 = vector.extract_strided_slice %333 {offsets = [0, 0], sizes = [8, 32], strides = [1, 1]} : vector<8x64xf32> to vector<8x32xf32>
    %335 = vector.extract_strided_slice %333 {offsets = [0, 32], sizes = [8, 32], strides = [1, 1]} : vector<8x64xf32> to vector<8x32xf32>
    %336 = vector.extract_strided_slice %322 {offsets = [0, 64], sizes = [8, 32], strides = [1, 1]} : vector<8x96xf32> to vector<8x32xf32>
    %337 = vector.extract_strided_slice %325 {offsets = [0, 64], sizes = [8, 32], strides = [1, 1]} : vector<8x96xf32> to vector<8x32xf32>
    %338 = arith.mulf %334, %337 : vector<8x32xf32>
    %339 = arith.addf %336, %338 : vector<8x32xf32>
    %340 = math.tanh %339 : vector<8x32xf32>
    %cst_61 = arith.constant 1.000000e+00 : f32
    %341 = vector.broadcast %cst_61 : f32 to vector<8x32xf32>
    %342 = arith.subf %341, %335 : vector<8x32xf32>
    %343 = arith.mulf %342, %340 : vector<8x32xf32>
    %344 = arith.mulf %335, %306 : vector<8x32xf32>
    %345 = arith.addf %343, %344 : vector<8x32xf32>
    %c0_62 = arith.constant 0 : index
    %c0_63 = arith.constant 0 : index
    %346 = vector.load %arg16[%c0_62, %c0_63] : memref<40x32xf32, #tpu.memory_space<vmem>>, vector<8x32xf32>
    tpu.vector_store %arg16[%c0_62, %c0_63], %345 {strides = array<i32>} : memref<40x32xf32, #tpu.memory_space<vmem>>, vector<8x32xf32>,
    %347 = vector.extract_strided_slice %319 {offsets = [8, 0], sizes = [8, 96], strides = [1, 1]} : vector<40x96xf32> to vector<8x96xf32>
    %cst_64 = arith.constant dense<0.000000e+00> : vector<8x96xf32>
    %348 = tpu.matmul %345, %320, %cst_64 {dimension_numbers = #tpu.dot_dimension_numbers<[1], [0], [0], [1], [0, 0, 1, 1], [], []>} : vector<8x32xf32>, vector<32x96xf32>, vector<8x96xf32> -> vector<8x96xf32>
    %349 = vector.broadcast %321 : vector<1x96xf32> to vector<8x96xf32>
    %350 = arith.addf %348, %349 : vector<8x96xf32>
    %351 = vector.extract_strided_slice %347 {offsets = [0, 0], sizes = [8, 64], strides = [1, 1]} : vector<8x96xf32> to vector<8x64xf32>
    %352 = vector.extract_strided_slice %350 {offsets = [0, 0], sizes = [8, 64], strides = [1, 1]} : vector<8x96xf32> to vector<8x64xf32>
    %353 = arith.addf %351, %352 : vector<8x64xf32>
    %354 = arith.negf %353 : vector<8x64xf32>
    %355 = math.exp %354 : vector<8x64xf32>
    %cst_65 = arith.constant 1.000000e+00 : f32
    %356 = vector.broadcast %cst_65 : f32 to vector<8x64xf32>
    %357 = arith.addf %356, %355 : vector<8x64xf32>
    %358 = arith.divf %356, %357 : vector<8x64xf32>
    %359 = vector.extract_strided_slice %358 {offsets = [0, 0], sizes = [8, 32], strides = [1, 1]} : vector<8x64xf32> to vector<8x32xf32>
    %360 = vector.extract_strided_slice %358 {offsets = [0, 32], sizes = [8, 32], strides = [1, 1]} : vector<8x64xf32> to vector<8x32xf32>
    %361 = vector.extract_strided_slice %347 {offsets = [0, 64], sizes = [8, 32], strides = [1, 1]} : vector<8x96xf32> to vector<8x32xf32>
    %362 = vector.extract_strided_slice %350 {offsets = [0, 64], sizes = [8, 32], strides = [1, 1]} : vector<8x96xf32> to vector<8x32xf32>
    %363 = arith.mulf %359, %362 : vector<8x32xf32>
    %364 = arith.addf %361, %363 : vector<8x32xf32>
    %365 = math.tanh %364 : vector<8x32xf32>
    %cst_66 = arith.constant 1.000000e+00 : f32
    %366 = vector.broadcast %cst_66 : f32 to vector<8x32xf32>
    %367 = arith.subf %366, %360 : vector<8x32xf32>
    %368 = arith.mulf %367, %365 : vector<8x32xf32>
    %369 = arith.mulf %360, %345 : vector<8x32xf32>
    %370 = arith.addf %368, %369 : vector<8x32xf32>
    %c8 = arith.constant 8 : index
    %c0_67 = arith.constant 0 : index
    %371 = vector.load %arg16[%c8, %c0_67] : memref<40x32xf32, #tpu.memory_space<vmem>>, vector<8x32xf32>
    tpu.vector_store %arg16[%c8, %c0_67], %370 {strides = array<i32>} : memref<40x32xf32, #tpu.memory_space<vmem>>, vector<8x32xf32>,
    %372 = vector.extract_strided_slice %319 {offsets = [16, 0], sizes = [8, 96], strides = [1, 1]} : vector<40x96xf32> to vector<8x96xf32>
    %cst_68 = arith.constant dense<0.000000e+00> : vector<8x96xf32>
    %373 = tpu.matmul %370, %320, %cst_68 {dimension_numbers = #tpu.dot_dimension_numbers<[1], [0], [0], [1], [0, 0, 1, 1], [], []>} : vector<8x32xf32>, vector<32x96xf32>, vector<8x96xf32> -> vector<8x96xf32>
    %374 = vector.broadcast %321 : vector<1x96xf32> to vector<8x96xf32>
    %375 = arith.addf %373, %374 : vector<8x96xf32>
    %376 = vector.extract_strided_slice %372 {offsets = [0, 0], sizes = [8, 64], strides = [1, 1]} : vector<8x96xf32> to vector<8x64xf32>
    %377 = vector.extract_strided_slice %375 {offsets = [0, 0], sizes = [8, 64], strides = [1, 1]} : vector<8x96xf32> to vector<8x64xf32>
    %378 = arith.addf %376, %377 : vector<8x64xf32>
    %379 = arith.negf %378 : vector<8x64xf32>
    %380 = math.exp %379 : vector<8x64xf32>
    %cst_69 = arith.constant 1.000000e+00 : f32
    %381 = vector.broadcast %cst_69 : f32 to vector<8x64xf32>
    %382 = arith.addf %381, %380 : vector<8x64xf32>
    %383 = arith.divf %381, %382 : vector<8x64xf32>
    %384 = vector.extract_strided_slice %383 {offsets = [0, 0], sizes = [8, 32], strides = [1, 1]} : vector<8x64xf32> to vector<8x32xf32>
    %385 = vector.extract_strided_slice %383 {offsets = [0, 32], sizes = [8, 32], strides = [1, 1]} : vector<8x64xf32> to vector<8x32xf32>
    %386 = vector.extract_strided_slice %372 {offsets = [0, 64], sizes = [8, 32], strides = [1, 1]} : vector<8x96xf32> to vector<8x32xf32>
    %387 = vector.extract_strided_slice %375 {offsets = [0, 64], sizes = [8, 32], strides = [1, 1]} : vector<8x96xf32> to vector<8x32xf32>
    %388 = arith.mulf %384, %387 : vector<8x32xf32>
    %389 = arith.addf %386, %388 : vector<8x32xf32>
    %390 = math.tanh %389 : vector<8x32xf32>
    %cst_70 = arith.constant 1.000000e+00 : f32
    %391 = vector.broadcast %cst_70 : f32 to vector<8x32xf32>
    %392 = arith.subf %391, %385 : vector<8x32xf32>
    %393 = arith.mulf %392, %390 : vector<8x32xf32>
    %394 = arith.mulf %385, %370 : vector<8x32xf32>
    %395 = arith.addf %393, %394 : vector<8x32xf32>
    %c16 = arith.constant 16 : index
    %c0_71 = arith.constant 0 : index
    %396 = vector.load %arg16[%c16, %c0_71] : memref<40x32xf32, #tpu.memory_space<vmem>>, vector<8x32xf32>
    tpu.vector_store %arg16[%c16, %c0_71], %395 {strides = array<i32>} : memref<40x32xf32, #tpu.memory_space<vmem>>, vector<8x32xf32>,
    %397 = vector.extract_strided_slice %319 {offsets = [24, 0], sizes = [8, 96], strides = [1, 1]} : vector<40x96xf32> to vector<8x96xf32>
    %cst_72 = arith.constant dense<0.000000e+00> : vector<8x96xf32>
    %398 = tpu.matmul %395, %320, %cst_72 {dimension_numbers = #tpu.dot_dimension_numbers<[1], [0], [0], [1], [0, 0, 1, 1], [], []>} : vector<8x32xf32>, vector<32x96xf32>, vector<8x96xf32> -> vector<8x96xf32>
    %399 = vector.broadcast %321 : vector<1x96xf32> to vector<8x96xf32>
    %400 = arith.addf %398, %399 : vector<8x96xf32>
    %401 = vector.extract_strided_slice %397 {offsets = [0, 0], sizes = [8, 64], strides = [1, 1]} : vector<8x96xf32> to vector<8x64xf32>
    %402 = vector.extract_strided_slice %400 {offsets = [0, 0], sizes = [8, 64], strides = [1, 1]} : vector<8x96xf32> to vector<8x64xf32>
    %403 = arith.addf %401, %402 : vector<8x64xf32>
    %404 = arith.negf %403 : vector<8x64xf32>
    %405 = math.exp %404 : vector<8x64xf32>
    %cst_73 = arith.constant 1.000000e+00 : f32
    %406 = vector.broadcast %cst_73 : f32 to vector<8x64xf32>
    %407 = arith.addf %406, %405 : vector<8x64xf32>
    %408 = arith.divf %406, %407 : vector<8x64xf32>
    %409 = vector.extract_strided_slice %408 {offsets = [0, 0], sizes = [8, 32], strides = [1, 1]} : vector<8x64xf32> to vector<8x32xf32>
    %410 = vector.extract_strided_slice %408 {offsets = [0, 32], sizes = [8, 32], strides = [1, 1]} : vector<8x64xf32> to vector<8x32xf32>
    %411 = vector.extract_strided_slice %397 {offsets = [0, 64], sizes = [8, 32], strides = [1, 1]} : vector<8x96xf32> to vector<8x32xf32>
    %412 = vector.extract_strided_slice %400 {offsets = [0, 64], sizes = [8, 32], strides = [1, 1]} : vector<8x96xf32> to vector<8x32xf32>
    %413 = arith.mulf %409, %412 : vector<8x32xf32>
    %414 = arith.addf %411, %413 : vector<8x32xf32>
    %415 = math.tanh %414 : vector<8x32xf32>
    %cst_74 = arith.constant 1.000000e+00 : f32
    %416 = vector.broadcast %cst_74 : f32 to vector<8x32xf32>
    %417 = arith.subf %416, %410 : vector<8x32xf32>
    %418 = arith.mulf %417, %415 : vector<8x32xf32>
    %419 = arith.mulf %410, %395 : vector<8x32xf32>
    %420 = arith.addf %418, %419 : vector<8x32xf32>
    %c24 = arith.constant 24 : index
    %c0_75 = arith.constant 0 : index
    %421 = vector.load %arg16[%c24, %c0_75] : memref<40x32xf32, #tpu.memory_space<vmem>>, vector<8x32xf32>
    tpu.vector_store %arg16[%c24, %c0_75], %420 {strides = array<i32>} : memref<40x32xf32, #tpu.memory_space<vmem>>, vector<8x32xf32>,
    %422 = vector.extract_strided_slice %319 {offsets = [32, 0], sizes = [8, 96], strides = [1, 1]} : vector<40x96xf32> to vector<8x96xf32>
    %cst_76 = arith.constant dense<0.000000e+00> : vector<8x96xf32>
    %423 = tpu.matmul %420, %320, %cst_76 {dimension_numbers = #tpu.dot_dimension_numbers<[1], [0], [0], [1], [0, 0, 1, 1], [], []>} : vector<8x32xf32>, vector<32x96xf32>, vector<8x96xf32> -> vector<8x96xf32>
    %424 = vector.broadcast %321 : vector<1x96xf32> to vector<8x96xf32>
    %425 = arith.addf %423, %424 : vector<8x96xf32>
    %426 = vector.extract_strided_slice %422 {offsets = [0, 0], sizes = [8, 64], strides = [1, 1]} : vector<8x96xf32> to vector<8x64xf32>
    %427 = vector.extract_strided_slice %425 {offsets = [0, 0], sizes = [8, 64], strides = [1, 1]} : vector<8x96xf32> to vector<8x64xf32>
    %428 = arith.addf %426, %427 : vector<8x64xf32>
    %429 = arith.negf %428 : vector<8x64xf32>
    %430 = math.exp %429 : vector<8x64xf32>
    %cst_77 = arith.constant 1.000000e+00 : f32
    %431 = vector.broadcast %cst_77 : f32 to vector<8x64xf32>
    %432 = arith.addf %431, %430 : vector<8x64xf32>
    %433 = arith.divf %431, %432 : vector<8x64xf32>
    %434 = vector.extract_strided_slice %433 {offsets = [0, 0], sizes = [8, 32], strides = [1, 1]} : vector<8x64xf32> to vector<8x32xf32>
    %435 = vector.extract_strided_slice %433 {offsets = [0, 32], sizes = [8, 32], strides = [1, 1]} : vector<8x64xf32> to vector<8x32xf32>
    %436 = vector.extract_strided_slice %422 {offsets = [0, 64], sizes = [8, 32], strides = [1, 1]} : vector<8x96xf32> to vector<8x32xf32>
    %437 = vector.extract_strided_slice %425 {offsets = [0, 64], sizes = [8, 32], strides = [1, 1]} : vector<8x96xf32> to vector<8x32xf32>
    %438 = arith.mulf %434, %437 : vector<8x32xf32>
    %439 = arith.addf %436, %438 : vector<8x32xf32>
    %440 = math.tanh %439 : vector<8x32xf32>
    %cst_78 = arith.constant 1.000000e+00 : f32
    %441 = vector.broadcast %cst_78 : f32 to vector<8x32xf32>
    %442 = arith.subf %441, %435 : vector<8x32xf32>
    %443 = arith.mulf %442, %440 : vector<8x32xf32>
    %444 = arith.mulf %435, %420 : vector<8x32xf32>
    %445 = arith.addf %443, %444 : vector<8x32xf32>
    %c32 = arith.constant 32 : index
    %c0_79 = arith.constant 0 : index
    %446 = vector.load %arg16[%c32, %c0_79] : memref<40x32xf32, #tpu.memory_space<vmem>>, vector<8x32xf32>
    tpu.vector_store %arg16[%c32, %c0_79], %445 {strides = array<i32>} : memref<40x32xf32, #tpu.memory_space<vmem>>, vector<8x32xf32>,
    %c0_80 = arith.constant 0 : index
    %c0_81 = arith.constant 0 : index
    %447 = vector.load %arg16[%c0_80, %c0_81] : memref<40x32xf32, #tpu.memory_space<vmem>>, vector<40x32xf32>
    %c0_82 = arith.constant 0 : index
    %c0_83 = arith.constant 0 : index
    %448 = vector.load %arg13[%c0_82, %c0_83] : memref<32x128xf32, #tpu.memory_space<vmem>>, vector<32x128xf32>
    %cst_84 = arith.constant dense<0.000000e+00> : vector<40x128xf32>
    %449 = tpu.matmul %447, %448, %cst_84 {dimension_numbers = #tpu.dot_dimension_numbers<[1], [0], [0], [1], [0, 0, 1, 1], [], []>} : vector<40x32xf32>, vector<32x128xf32>, vector<40x128xf32> -> vector<40x128xf32>
    %c0_85 = arith.constant 0 : index
    %c0_86 = arith.constant 0 : index
    %450 = vector.load %arg14[%c0_85, %c0_86] : memref<1x128xf32, #tpu.memory_space<vmem>>, vector<1x128xf32>
    %451 = vector.broadcast %450 : vector<1x128xf32> to vector<40x128xf32>
    %452 = arith.addf %449, %451 : vector<40x128xf32>
    %cst_87 = arith.constant 0.000000e+00 : f32
    %453 = vector.broadcast %cst_87 : f32 to vector<8x128xf32>
    %c0_88 = arith.constant 0 : index
    %c0_89 = arith.constant 0 : index
    %454 = vector.load %arg15[%c0_88, %c0_89] : memref<48x128xf32, #tpu.memory_space<vmem>>, vector<8x128xf32>
    tpu.vector_store %arg15[%c0_88, %c0_89], %453 {strides = array<i32>} : memref<48x128xf32, #tpu.memory_space<vmem>>, vector<8x128xf32>,
    %c8_90 = arith.constant 8 : index
    %c0_91 = arith.constant 0 : index
    %455 = vector.load %arg15[%c8_90, %c0_91] : memref<48x128xf32, #tpu.memory_space<vmem>>, vector<40x128xf32>
    tpu.vector_store %arg15[%c8_90, %c0_91], %452 {strides = array<i32>} : memref<48x128xf32, #tpu.memory_space<vmem>>, vector<40x128xf32>,
    return
  }
}

</mosaic_0001>

<bundles_post_ra>
// kernel: seq2seq_forward.1
= control target key start
LH: loop header
LB: loop body
LE: loop exit
PB: predicated region body
PF: predicated region fallthrough
CT: control target
= control target key end

     0   :  { %v3067_v0 = vmov 0.0   ;;  %vm3068_vm0 = vmmov 0   ;;  %v3069_v3 = vmov 0   ;;  %vm134_vm1 = vcmask 261120   ;;  %s3070_s22 = smov 64   ;;  %s3810_s4 = inlined_call_operand.vmem [shape: f32[32,96], index: 4, kind: input, shape index: {}]   ;;  %s3811_s0 = inlined_call_operand.vmem [shape: s32[80,1], index: 0, kind: input, shape index: {}]   ;;  %s3812_s3 = inlined_call_operand.vmem [shape: f32[50,32], index: 3, kind: input, shape index: {}]   ;;  %s3813_s5 = inlined_call_operand.vmem [shape: f32[32,96], index: 5, kind: input, shape index: {}]   ;;  %s3814_s6 = inlined_call_operand.vmem [shape: f32[1,96], index: 6, kind: input, shape index: {}]   ;;  %s3815_s7 = inlined_call_operand.vmem [shape: f32[1,96], index: 7, kind: input, shape index: {}]   ;;  %s3816_s2 = inlined_call_operand.vmem [shape: s32[8,1], index: 2, kind: input, shape index: {}]   ;;  %s3817_s9 = inlined_call_operand.vmem [shape: f32[32,96], index: 9, kind: input, shape index: {}]   ;;  %s3818_s8 = inlined_call_operand.vmem [shape: f32[64,32], index: 8, kind: input, shape index: {}]   ;;  %s3819_s1 = inlined_call_operand.vmem [shape: s32[40,1], index: 1, kind: input, shape index: {}]   ;;  %s3820_s10 = inlined_call_operand.vmem [shape: f32[32,96], index: 10, kind: input, shape index: {}]   ;;  %s3821_s12 = inlined_call_operand.vmem [shape: f32[1,96], index: 12, kind: input, shape index: {}]   ;;  %s3822_s11 = inlined_call_operand.vmem [shape: f32[1,96], index: 11, kind: input, shape index: {}]   ;;  %s3823_s13 = inlined_call_operand.vmem [shape: f32[32,128], index: 13, kind: input, shape index: {}]   ;;  %s3824_s15 = inlined_call_operand.vmem [shape: f32[48,128], index: 15, kind: output, shape index: {}]   ;;  %s3825_s14 = inlined_call_operand.vmem [shape: f32[1,128], index: 14, kind: input, shape index: {}]  }
   0x1   :  { %2673 = vmatprep.subr.mxu0 %v3067_v0  ;;  %v133_v1 = vld [vmem:[%s3810_s4 + $0x18] sm:$0xff]  ;;  %v132_v2 = vld [vmem:[%s3810_s4 + $0x10] sm:$0xff]  ;;  %2681 = vmatprep.mubr.msk.f32.mxu0 %vm3068_vm0, %v3067_v0  ;;  %v131_v4 = vld [vmem:[%s3810_s4 + $0x8] sm:$0xff]  ;;  %v61_v25 = vlaneseq  ;;  %vm263_vm2 = vcmask 408576   ;;  %vm294_vm4 = vcmask 1041408   ;;  %2441 = vst [vmem:[%s3824_s15] sm:$0xff] %v3067_v0 }
   0x2   :  { %2674 = vmatpush3.msra.mxu0 %v133_v1  ;;  %2975 = vset.pattern.permute.xlu0 %v3069_v3  ;;  %v51_v5 = vld [vmem:[%s3811_s0] sm:$0xff]  ;;  %v53_v7 = vld [vmem:[%s3811_s0 + $0x10] sm:$0xff]  ;;  %v52_v9 = vld [vmem:[%s3811_s0 + $0x8] sm:$0xff] }
   0x3   :  { %2675 = vmatprep.subr.mxu0 %v3067_v0  ;;  %2976 = vset.pattern.permute.xlu1 %v3069_v3  ;;  %v130_v6 = vld [vmem:[%s3810_s4] sm:$0xff]  ;;  %v54_v10 = vld [vmem:[%s3811_s0 + $0x18] sm:$0xff]  ;;  %v124_v11 = vld [vmem:[%s3812_s3 + $0x8] sm:$0xff]  ;;  %v3266_v27 = vand.u32 127, %v61_v25 }
   0x4   :  { %2676 = vmatpush3.msra.mxu0 %v132_v2  ;;  %64 = vperm.xlu0 %2975, %v51_v5   ;;  %v123_v8 = vld [vmem:[%s3812_s3] sm:$0xff]  ;;  %v56_v13 = vld [vmem:[%s3811_s0 + $0x28] sm:$0xff]  ;;  %v125_v14 = vld [vmem:[%s3812_s3 + $0x10] sm:$0xff] }
   0x5   :  { %2677 = vmatprep.subr.mxu0 %v3067_v0  ;;  %70 = vperm.xlu1 %2976, %v53_v7   ;;  %v55_v12 = vld [vmem:[%s3811_s0 + $0x20] sm:$0xff]  ;;  %v57_v15 = vld [vmem:[%s3811_s0 + $0x30] sm:$0xff]  ;;  %v58_v16 = vld [vmem:[%s3811_s0 + $0x38] sm:$0xff] }
   0x6   :  { %2678 = vmatpush3.msra.mxu0 %v131_v4  ;;  %v126_v17 = vld [vmem:[%s3812_s3 + $0x18] sm:$0xff]  ;;  %v59_v18 = vld [vmem:[%s3811_s0 + $0x40] sm:$0xff]  ;;  %v60_v19 = vld [vmem:[%s3811_s0 + $0x48] sm:$0xff] }
   0x7   :  { %2679 = vmatprep.subr.mxu0 %v3067_v0  ;;  %v127_v20 = vld [vmem:[%s3812_s3 + $0x20] sm:$0xff]  ;;  %v128_v21 = vld [vmem:[%s3812_s3 + $0x28] sm:$0xff]  ;;  %v129_v22 = vld [vmem:[%s3812_s3 + $0x30] sm:$0x3] }
   0x8   :  { %2680 = vmatpush3.msra.mxu0 %v130_v6  ;;  %67 = vperm.xlu0 %2975, %v52_v9   ;;  %v3248_v23 = vld [vmem:[%s3813_s5 + $0x18] sm:$0xff]  ;;  %v3255_v24 = vld [vmem:[%s3813_s5 + $0x10] sm:$0xff]  ;;  %v3262_v26 = vld [vmem:[%s3813_s5 + $0x8] sm:$0xff] }
   0x9   :  { %2682 = vmatmul.mubr.msk.f32.vlgmr.msra.gmra.mxu0 %vm134_vm1, %v123_v8  ;;  %73 = vperm.xlu1 %2976, %v54_v10   ;;  %v3271_v29 = vld [vmem:[%s3813_s5] sm:$0xff] }
   0xa   :  { %2684 = vmatprep.mubr.msk.f32.mxu0 %vm3068_vm0, %v3067_v0  ;;  %2742 = vmatprep.subr.mxu0 %v3067_v0  ;;  %v2468_v63 = vld [vmem:[%s3814_s6] ss:$0 sm:$0xff] }
   0xb   :  { %2743 = vmatpush3.msra.mxu0 %v3248_v23 }
   0xc   :  { %76 = vperm.xlu0 %2975, %v55_v12   ;;  %2744 = vmatprep.subr.mxu0 %v3067_v0 }
   0xd   :  { %2685 = vmatmul.mubr.msk.f32.gmra.mxu0 %vm134_vm1, %v124_v11  ;;  %79 = vperm.xlu1 %2976, %v56_v13  }
   0xe   :  { %2687 = vmatprep.mubr.msk.f32.mxu0 %vm3068_vm0, %v3067_v0  ;;  %2745 = vmatpush3.msra.mxu0 %v3255_v24 }
   0xf   :  { %2746 = vmatprep.subr.mxu0 %v3067_v0 }
  0x10   :  { %82 = vperm.xlu0 %2975, %v57_v15   ;;  %2747 = vmatpush3.msra.mxu0 %v3262_v26 }
  0x11   :  { %2688 = vmatmul.mubr.msk.f32.gmra.mxu0 %vm134_vm1, %v125_v14  ;;  %85 = vperm.xlu1 %2976, %v58_v16  }
  0x12   :  { %2690 = vmatprep.mubr.msk.f32.mxu0 %vm3068_vm0, %v3067_v0  ;;  %2748 = vmatprep.subr.mxu0 %v3067_v0 }
  0x13   :  { %2749 = vmatpush3.msra.mxu0 %v3271_v29 }
  0x14   :  { %88 = vperm.xlu0 %2975, %v59_v18   ;;  %2764 = vmatprep.subr.mxu0 %v3067_v0 }
  0x15   :  { %2691 = vmatmul.mubr.msk.f32.gmra.mxu0 %vm134_vm1, %v126_v17  ;;  %91 = vperm.xlu1 %2976, %v60_v19  }
  0x16   :  { %2693 = vmatprep.mubr.msk.f32.mxu0 %vm3068_vm0, %v3067_v0 }
  0x19   :  { %2694 = vmatmul.mubr.msk.f32.gmra.mxu0 %vm134_vm1, %v127_v20  ;;  %v3349_v20 = vld [vmem:[%s3815_s7] ss:$0 sm:$0xff] }
  0x1a   :  { %2696 = vmatprep.mubr.msk.f32.mxu0 %vm3068_vm0, %v3067_v0 }
  0x1d   :  { %2697 = vmatmul.mubr.msk.f32.gmra.mxu0 %vm134_vm1, %v128_v21  ;;  %v3354_v21 = vld [vmem:[%s3816_s2] sm:$0xff]  ;;  %s3071_s2 = smov 96  }
  0x1e   :  { %2699 = vmatprep.mubr.msk.f32.mxu0 %vm3068_vm0, %v3067_v0  ;;  %vm523_vm14 = vcmp.gt.s32.totalorder %v3354_v21, 0 }
  0x21   :  { %2700 = vmatmul.mubr.msk.f32.gmra.mxu0 %vm134_vm1, %v129_v22 }
  0x22   :  { %2750 = vmatprep.mubr.msk.f32.mxu0 %vm3068_vm0, %v3067_v0 }
  0x7f   :  { %v65_v28 = vpop.permute.xlu0 %64 }
  0x80   :  { %vm93_vm3 = vcmp.eq.s32.totalorder %v65_v28, %v3266_v27  ;;  %v71_v43 = vpop.permute.xlu1 %70 }
  0x81   :  { %v2451_v30 = vsel %vm93_vm3, 1.0, %v3067_v0  ;;  %vm95_vm5 = vcmp.eq.s32.totalorder %v71_v43, %v3266_v27 }
  0x82   :  { %2716 = vmatprep.mubr.msk.f32.mxu1 %vm263_vm2, %v2451_v30  ;;  %v2453_v50 = vsel %vm95_vm5, 1.0, %v3067_v0 }
  0x83   :  { %v68_v46 = vpop.permute.xlu0 %67 }
  0x84   :  { %v74_v47 = vpop.permute.xlu1 %73  ;;  %vm94_vm6 = vcmp.eq.s32.totalorder %v68_v46, %v3266_v27 }
  0x85   :  { %v2452_v51 = vsel %vm94_vm6, 1.0, %v3067_v0  ;;  %vm96_vm7 = vcmp.eq.s32.totalorder %v74_v47, %v3266_v27  ;;  %vm847_vm6 = vcmp.gt.s32.totalorder %v3354_v21, 3 }
  0x86   :  { %v2454_v53 = vsel %vm96_vm7, 1.0, %v3067_v0 }
  0x87   :  { %v77_v48 = vpop.permute.xlu0 %76 }
  0x88   :  { %v80_v49 = vpop.permute.xlu1 %79  ;;  %vm97_vm8 = vcmp.eq.s32.totalorder %v77_v48, %v3266_v27 }
  0x89   :  { %v2455_v55 = vsel %vm97_vm8, 1.0, %v3067_v0  ;;  %vm98_vm9 = vcmp.eq.s32.totalorder %v80_v49, %v3266_v27  ;;  %vm955_vm8 = vcmp.gt.s32.totalorder %v3354_v21, 4 }
  0x8a   :  { %v2456_v57 = vsel %vm98_vm9, 1.0, %v3067_v0 }
  0x8b   :  { %v83_v52 = vpop.permute.xlu0 %82 }
  0x8c   :  { %v86_v54 = vpop.permute.xlu1 %85  ;;  %vm99_vm10 = vcmp.eq.s32.totalorder %v83_v52, %v3266_v27 }
  0x8d   :  { %v2457_v58 = vsel %vm99_vm10, 1.0, %v3067_v0  ;;  %vm100_vm11 = vcmp.eq.s32.totalorder %v86_v54, %v3266_v27  ;;  %vm1063_vm10 = vcmp.gt.s32.totalorder %v3354_v21, 5 }
  0x8e   :  { %v2458_v60 = vsel %vm100_vm11, 1.0, %v3067_v0 }
  0x8f   :  { %v89_v56 = vpop.permute.xlu0 %88 }
  0x90   :  { %vm101_vm12 = vcmp.eq.s32.totalorder %v89_v56, %v3266_v27  ;;  %v92_v59 = vpop.permute.xlu1 %91 }
  0x91   :  { %v2459_v61 = vsel %vm101_vm12, 1.0, %v3067_v0  ;;  %vm102_vm13 = vcmp.eq.s32.totalorder %v92_v59, %v3266_v27  ;;  %vm1171_vm12 = vcmp.gt.s32.totalorder %v3354_v21, 6 }
  0x92   :  { %v2460_v62 = vsel %vm102_vm13, 1.0, %v3067_v0 }
  0xc9   :  { %v222_v31 = vpop.f32.mrf.mxu0 }
  0xcb   :  { %v2683_v32 = vpop.f32.mrf.mxu0 }
  0xcd   :  { %v227_v33 = vpop.f32.mrf.mxu0 }
  0xcf   :  { %v2686_v34 = vpop.f32.mrf.mxu0 }
  0xd1   :  { %v232_v35 = vpop.f32.mrf.mxu0 }
  0xd3   :  { %v2689_v36 = vpop.f32.mrf.mxu0 }
  0xd5   :  { %v237_v37 = vpop.f32.mrf.mxu0 }
  0xd7   :  { %v2692_v38 = vpop.f32.mrf.mxu0 }
  0xd9   :  { %v242_v39 = vpop.f32.mrf.mxu0 }
  0xdb   :  { %v2695_v40 = vpop.f32.mrf.mxu0 }
  0xdd   :  { %v247_v41 = vpop.f32.mrf.mxu0 }
  0xdf   :  { %v2698_v42 = vpop.f32.mrf.mxu0 }
  0xe1   :  { %v252_v44 = vpop.f32.mrf.mxu0 }
  0xe2   :  { %2702 = vmatprep.subr.msk.mxu1 %vm294_vm4, %v252_v44 }
  0xe3   :  { %v2701_v45 = vpop.f32.mrf.mxu0  ;;  %2703 = vmatpush3.msk.msra.mxu1 %vm294_vm4, %v252_v44  ;;  %vm739_vm4 = vcmp.gt.s32.totalorder %v3354_v21, 2 }
  0xe4   :  { %2704 = vmatprep.subr.mxu1 %v247_v41 }
  0xe5   :  { %2705 = vmatpush3.msra.mxu1 %v247_v41 }
  0xe6   :  { %2706 = vmatprep.subr.mxu1 %v242_v39 }
  0xe7   :  { %2707 = vmatpush3.msra.mxu1 %v242_v39 }
  0xe8   :  { %2708 = vmatprep.subr.mxu1 %v237_v37 }
  0xe9   :  { %2709 = vmatpush3.msra.mxu1 %v237_v37 }
  0xea   :  { %2710 = vmatprep.subr.mxu1 %v232_v35 }
  0xeb   :  { %2711 = vmatpush3.msra.mxu1 %v232_v35 }
  0xec   :  { %2712 = vmatprep.subr.mxu1 %v227_v33 }
  0xed   :  { %2713 = vmatpush3.msra.mxu1 %v227_v33 }
  0xee   :  { %2714 = vmatprep.subr.mxu1 %v222_v31 }
  0xef   :  { %2715 = vmatpush3.msra.mxu1 %v222_v31  ;;  %v524_v31 = vsel %vm523_vm14, 1, %v3069_v3  ;;  %vm1279_vm14 = vcmp.gt.s32.totalorder %v3354_v21, 7 }
  0xf0   :  { %2717 = vmatmul.mubr.msk.f32.vlgmr.msra.gmra.mxu1 %vm263_vm2, %v2452_v51  ;;  %2731 = vmatprep.subr.mxu1 %v3067_v0 }
  0xf1   :  { %2719 = vmatprep.mubr.msk.f32.mxu1 %vm263_vm2, %v2453_v50  ;;  %2732 = vmatpush3.msra.mxu1 %v3248_v23 }
  0xf2   :  { %2733 = vmatprep.subr.mxu1 %v3067_v0 }
  0xf3   :  { %2734 = vmatpush3.msra.mxu1 %v3255_v24 }
  0xf4   :  { %2720 = vmatmul.mubr.msk.f32.gmra.mxu1 %vm263_vm2, %v2454_v53  ;;  %2735 = vmatprep.subr.mxu1 %v3067_v0 }
  0xf5   :  { %2722 = vmatprep.mubr.msk.f32.mxu1 %vm263_vm2, %v2455_v55  ;;  %2736 = vmatpush3.msra.mxu1 %v3262_v26 }
  0xf6   :  { %2737 = vmatprep.subr.mxu1 %v3067_v0 }
  0xf7   :  { %2738 = vmatpush3.msra.mxu1 %v3271_v29 }
  0xf8   :  { %2723 = vmatmul.mubr.msk.f32.gmra.mxu1 %vm263_vm2, %v2456_v57  ;;  %2753 = vmatprep.subr.mxu1 %v3067_v0 }
  0xf9   :  { %2725 = vmatprep.mubr.msk.f32.mxu1 %vm263_vm2, %v2457_v58 }
  0xfc   :  { %2726 = vmatmul.mubr.msk.f32.gmra.mxu1 %vm263_vm2, %v2458_v60 }
  0xfd   :  { %2728 = vmatprep.mubr.msk.f32.mxu1 %vm263_vm2, %v2459_v61 }
 0x100   :  { %2729 = vmatmul.mubr.msk.f32.gmra.mxu1 %vm263_vm2, %v2460_v62  ;;  %vm631_vm2 = vcmp.gt.s32.totalorder %v3354_v21, 1 }
 0x101   :  { %2739 = vmatprep.mubr.msk.f32.mxu1 %vm3068_vm0, %v3067_v0  ;;  %v632_v54 = vsel %vm631_vm2, 1, %v3069_v3  ;;  %vm1387_vm2 = vcmp.gt.s32.totalorder %v3354_v21, 8 }
 0x104   :  { %2740 = vmatmul.mubr.f32.vlgmr.msra.gmra.mxu1 %v3067_v0 }
 0x105   :  { %2754 = vmatpush3.msra.mxu1 %v3248_v23  ;;  %2761 = vmatprep.mubr.msk.f32.mxu1 %vm3068_vm0, %v3067_v0 }
 0x106   :  { %2755 = vmatprep.subr.mxu1 %v3067_v0 }
 0x107   :  { %2756 = vmatpush3.msra.mxu1 %v3255_v24 }
 0x108   :  { %2757 = vmatprep.subr.mxu1 %v3067_v0 }
 0x109   :  { %2758 = vmatpush3.msra.mxu1 %v3262_v26 }
 0x10a   :  { %2759 = vmatprep.subr.mxu1 %v3067_v0 }
 0x10b   :  { %2760 = vmatpush3.msra.mxu1 %v3271_v29 }
 0x10c   :  { %2775 = vmatprep.subr.mxu1 %v3067_v0 }
 0x1b0   :  { %v2718_v1 = vpop.f32.mrf.mxu1 }
 0x1b1   :  { %v3330_v2 = vadd.f32 %v2718_v1, %v2468_v63 }
 0x1b2   :  { %v364_v4 = vpop.f32.mrf.mxu1 }
 0x1b3   :  { %v365_v32 = vadd.f32 %v2468_v63, %v364_v4 }
 0x1b4   :  { %v2721_v5 = vpop.f32.mrf.mxu1 }
 0x1b5   :  { %v3332_v6 = vadd.f32 %v2721_v5, %v2468_v63 }
 0x1b6   :  { %v374_v7 = vpop.f32.mrf.mxu1 }
 0x1b7   :  { %v3334_v8 = vadd.f32 %v2468_v63, %v374_v7 }
 0x1b8   :  { %v2724_v9 = vpop.f32.mrf.mxu1 }
 0x1b9   :  { %v3336_v10 = vadd.f32 %v2724_v9, %v2468_v63 }
 0x1ba   :  { %v384_v11 = vpop.f32.mrf.mxu1 }
 0x1bb   :  { %v3338_v12 = vadd.f32 %v2468_v63, %v384_v11 }
 0x1bc   :  { %v2727_v13 = vpop.f32.mrf.mxu1 }
 0x1bd   :  { %v3340_v14 = vadd.f32 %v2727_v13, %v2468_v63 }
 0x1be   :  { %v394_v15 = vpop.f32.mrf.mxu1 }
 0x1bf   :  { %v3342_v16 = vadd.f32 %v2468_v63, %v394_v15 }
 0x1c0   :  { %v2730_v17 = vpop.f32.mrf.mxu1 }
 0x1c1   :  { %v3344_v18 = vadd.f32 %v2730_v17, %v2468_v63 }
 0x1c2   :  { %v404_v19 = vpop.f32.mrf.mxu1 }
 0x1c3   :  { %v3356_v22 = vadd.f32 %v2468_v63, %v404_v19 }
 0x1c4   :  { %v493_v25 = vpop.f32.mrf.mxu1 }
 0x1c5   :  { %v494_v28 = vadd.f32 %v3349_v20, %v493_v25 }
 0x1c6   :  { %v2741_v30 = vpop.f32.mrf.mxu1 }
 0x1c7   :  { %505 = vrot.lane.b32.xlu0 %v494_v28, %s3070_s22  ;;  %v497_v33 = vadd.f32 %v494_v28, %v365_v32  ;;  %v740_v28 = vsel %vm739_vm4, 1, %v3069_v3  ;;  %vm1495_vm4 = vcmp.gt.s32.totalorder %v3354_v21, 9  ;;  %v1546_v21 = vld [vmem:[%s3817_s9 + $0x8] sm:$0xff] }
 0x1c9   :  { %v2481_v34 = vmul.f32 -1.442695, %v497_v33 }
 0x1cb   :  { %526 = vperm.xlu0 %2975, %v524_v31   ;;  %2977 = vpow2.f32 %v2481_v34 }
 0x1d8   :  { %v2978_v35 = vpop.eup %2977 }
 0x1d9   :  { %v501_v36 = vadd.f32 1.0, %v2978_v35 }
 0x1db   :  { %2979 = vrcp.f32 %v501_v36 }
 0x1e8   :  { %v2980_v37 = vpop.eup %2979 }
 0x1e9   :  { %v515_v43 = vsub.f32 1.0, %v2980_v37  ;;  %v521_v46 = vmul.f32 0.0, %v2980_v37 }
 0x239   :  { %v506_v38 = vpop.permute.xlu0 %505 }
 0x23a   :  { %v508_v39 = vmul.f32 %v2980_v37, %v506_v38 }
 0x23c   :  { %510 = vrot.lane.b32.xlu1 %v508_v39, %s3070_s22 }
 0x246   :  { %v527_v45 = vpop.permute.xlu0 %526 }
 0x247   :  { %vm528_vm15 = vcmp.eq.s32.totalorder %v527_v45, 1 }
 0x2ae   :  { %v511_v40 = vpop.permute.xlu1 %510 }
 0x2af   :  { %v513_v41 = vadd.f32 %v511_v40, %v365_v32 }
 0x2b1   :  { %2981 = vtanh.f32 %v513_v41 }
 0x2be   :  { %v2982_v42 = vpop.eup %2981 }
 0x2bf   :  { %517 = vrot.lane.b32.xlu1 %v2982_v42, %s3071_s2 }
 0x331   :  { %v518_v44 = vpop.permute.xlu1 %517 }
 0x332   :  { %v520_v47 = vmul.f32 %v518_v44, %v515_v43 }
 0x334   :  { %v522_v48 = vadd.f32 %v521_v46, %v520_v47 }
 0x336   :  { %v529_v49 = vsel %vm528_vm15, %v522_v48, 0.0 }
 0x337   :  { %531 = vrot.lane.b32.xlu0 %v529_v49, %s3071_s2 }
 0x3a9   :  { %v532_v50 = vpop.permute.xlu0 %531 }
 0x3aa   :  { %2751 = vmatmul.mubr.msk.f32.vlgmr.msra.gmra.mxu0 %vm134_vm1, %v532_v50  ;;  %v848_v50 = vsel %vm847_vm6, 1, %v3069_v3  ;;  %vm1685_vm6 = vcmask 523264  }
 0x3ab   :  { %2765 = vmatpush3.msra.mxu0 %v3248_v23  ;;  %2772 = vmatprep.mubr.msk.f32.mxu0 %vm3068_vm0, %v3067_v0 }
 0x3ac   :  { %2766 = vmatprep.subr.mxu0 %v3067_v0 }
 0x3ad   :  { %2767 = vmatpush3.msra.mxu0 %v3255_v24 }
 0x3ae   :  { %2768 = vmatprep.subr.mxu0 %v3067_v0 }
 0x3af   :  { %2769 = vmatpush3.msra.mxu0 %v3262_v26 }
 0x3b0   :  { %2770 = vmatprep.subr.mxu0 %v3067_v0 }
 0x3b1   :  { %2771 = vmatpush3.msra.mxu0 %v3271_v29 }
 0x3b2   :  { %2786 = vmatprep.subr.mxu0 %v3067_v0 }
 0x46a   :  { %v601_v51 = vpop.f32.mrf.mxu0 }
 0x46b   :  { %v602_v52 = vadd.f32 %v3349_v20, %v601_v51 }
 0x46c   :  { %v2752_v53 = vpop.f32.mrf.mxu0 }
 0x46d   :  { %613 = vrot.lane.b32.xlu1 %v602_v52, %s3070_s22  ;;  %v605_v55 = vadd.f32 %v602_v52, %v3330_v2 }
 0x46f   :  { %v2483_v56 = vmul.f32 -1.442695, %v605_v55 }
 0x471   :  { %634 = vperm.xlu1 %2976, %v632_v54   ;;  %2983 = vpow2.f32 %v2483_v56 }
 0x47e   :  { %v2984_v57 = vpop.eup %2983 }
 0x47f   :  { %v609_v58 = vadd.f32 1.0, %v2984_v57 }
 0x481   :  { %2985 = vrcp.f32 %v609_v58 }
 0x48e   :  { %v2986_v59 = vpop.eup %2985 }
 0x48f   :  { %v623_v4 = vsub.f32 1.0, %v2986_v59  ;;  %v629_v9 = vmul.f32 %v2986_v59, %v529_v49 }
 0x4df   :  { %v614_v60 = vpop.permute.xlu1 %613 }
 0x4e0   :  { %v616_v61 = vmul.f32 %v2986_v59, %v614_v60 }
 0x4e2   :  { %618 = vrot.lane.b32.xlu0 %v616_v61, %s3070_s22 }
 0x4ec   :  { %v635_v7 = vpop.permute.xlu1 %634 }
 0x4ed   :  { %vm636_vm3 = vcmp.eq.s32.totalorder %v635_v7, 1 }
 0x554   :  { %v619_v62 = vpop.permute.xlu0 %618 }
 0x555   :  { %v621_v63 = vadd.f32 %v619_v62, %v3330_v2 }
 0x557   :  { %2987 = vtanh.f32 %v621_v63 }
 0x564   :  { %v2988_v1 = vpop.eup %2987 }
 0x565   :  { %625 = vrot.lane.b32.xlu0 %v2988_v1, %s3071_s2 }
 0x5d7   :  { %v626_v5 = vpop.permute.xlu0 %625 }
 0x5d8   :  { %v628_v11 = vmul.f32 %v626_v5, %v623_v4 }
 0x5da   :  { %v630_v13 = vadd.f32 %v629_v9, %v628_v11 }
 0x5dc   :  { %v637_v15 = vsel %vm636_vm3, %v630_v13, %v529_v49 }
 0x5dd   :  { %639 = vrot.lane.b32.xlu1 %v637_v15, %s3071_s2 }
 0x64f   :  { %v640_v17 = vpop.permute.xlu1 %639 }
 0x650   :  { %2762 = vmatmul.mubr.msk.f32.vlgmr.msra.gmra.mxu1 %vm134_vm1, %v640_v17 }
 0x651   :  { %2776 = vmatpush3.msra.mxu1 %v3248_v23  ;;  %2783 = vmatprep.mubr.msk.f32.mxu1 %vm3068_vm0, %v3067_v0 }
 0x652   :  { %2777 = vmatprep.subr.mxu1 %v3067_v0 }
 0x653   :  { %2778 = vmatpush3.msra.mxu1 %v3255_v24 }
 0x654   :  { %2779 = vmatprep.subr.mxu1 %v3067_v0 }
 0x655   :  { %2780 = vmatpush3.msra.mxu1 %v3262_v26 }
 0x656   :  { %2781 = vmatprep.subr.mxu1 %v3067_v0 }
 0x657   :  { %2782 = vmatpush3.msra.mxu1 %v3271_v29 }
 0x658   :  { %2797 = vmatprep.subr.mxu1 %v3067_v0 }
 0x710   :  { %v709_v2 = vpop.f32.mrf.mxu1 }
 0x711   :  { %v710_v19 = vadd.f32 %v3349_v20, %v709_v2 }
 0x712   :  { %v2763_v25 = vpop.f32.mrf.mxu1 }
 0x713   :  { %721 = vrot.lane.b32.xlu0 %v710_v19, %s3070_s22  ;;  %v713_v30 = vadd.f32 %v710_v19, %v3334_v8 }
 0x715   :  { %v2485_v31 = vmul.f32 -1.442695, %v713_v30 }
 0x717   :  { %742 = vperm.xlu0 %2975, %v740_v28   ;;  %2989 = vpow2.f32 %v2485_v31 }
 0x724   :  { %v2990_v32 = vpop.eup %2989 }
 0x725   :  { %v717_v33 = vadd.f32 1.0, %v2990_v32 }
 0x727   :  { %2991 = vrcp.f32 %v717_v33 }
 0x734   :  { %v2992_v34 = vpop.eup %2991 }
 0x735   :  { %v731_v40 = vsub.f32 1.0, %v2992_v34  ;;  %v737_v43 = vmul.f32 %v2992_v34, %v637_v15 }
 0x785   :  { %v722_v35 = vpop.permute.xlu0 %721 }
 0x786   :  { %v724_v36 = vmul.f32 %v2992_v34, %v722_v35 }
 0x788   :  { %726 = vrot.lane.b32.xlu1 %v724_v36, %s3070_s22 }
 0x792   :  { %v743_v42 = vpop.permute.xlu0 %742 }
 0x793   :  { %vm744_vm5 = vcmp.eq.s32.totalorder %v743_v42, 1 }
 0x7fa   :  { %v727_v37 = vpop.permute.xlu1 %726 }
 0x7fb   :  { %v729_v38 = vadd.f32 %v727_v37, %v3334_v8 }
 0x7fd   :  { %2993 = vtanh.f32 %v729_v38 }
 0x80a   :  { %v2994_v39 = vpop.eup %2993 }
 0x80b   :  { %733 = vrot.lane.b32.xlu1 %v2994_v39, %s3071_s2 }
 0x87d   :  { %v734_v41 = vpop.permute.xlu1 %733 }
 0x87e   :  { %v736_v44 = vmul.f32 %v734_v41, %v731_v40 }
 0x880   :  { %v738_v45 = vadd.f32 %v737_v43, %v736_v44 }
 0x882   :  { %v745_v46 = vsel %vm744_vm5, %v738_v45, %v637_v15  ;;  %v956_v15 = vsel %vm955_vm8, 1, %v3069_v3  ;;  %v1064_v45 = vsel %vm1063_vm10, 1, %v3069_v3 }
 0x883   :  { %747 = vrot.lane.b32.xlu0 %v745_v46, %s3071_s2 }
 0x8f5   :  { %v748_v47 = vpop.permute.xlu0 %747 }
 0x8f6   :  { %2773 = vmatmul.mubr.msk.f32.vlgmr.msra.gmra.mxu0 %vm134_vm1, %v748_v47 }
 0x8f7   :  { %2787 = vmatpush3.msra.mxu0 %v3248_v23  ;;  %2794 = vmatprep.mubr.msk.f32.mxu0 %vm3068_vm0, %v3067_v0 }
 0x8f8   :  { %2788 = vmatprep.subr.mxu0 %v3067_v0 }
 0x8f9   :  { %2789 = vmatpush3.msra.mxu0 %v3255_v24 }
 0x8fa   :  { %2790 = vmatprep.subr.mxu0 %v3067_v0 }
 0x8fb   :  { %2791 = vmatpush3.msra.mxu0 %v3262_v26 }
 0x8fc   :  { %2792 = vmatprep.subr.mxu0 %v3067_v0 }
 0x8fd   :  { %2793 = vmatpush3.msra.mxu0 %v3271_v29 }
 0x8fe   :  { %2808 = vmatprep.subr.mxu0 %v3067_v0 }
 0x9b6   :  { %v817_v8 = vpop.f32.mrf.mxu0 }
 0x9b7   :  { %v818_v48 = vadd.f32 %v3349_v20, %v817_v8 }
 0x9b8   :  { %v2774_v49 = vpop.f32.mrf.mxu0 }
 0x9b9   :  { %829 = vrot.lane.b32.xlu1 %v818_v48, %s3070_s22  ;;  %v821_v51 = vadd.f32 %v818_v48, %v3332_v6 }
 0x9bb   :  { %v2487_v52 = vmul.f32 -1.442695, %v821_v51 }
 0x9bd   :  { %850 = vperm.xlu1 %2976, %v848_v50   ;;  %2995 = vpow2.f32 %v2487_v52 }
 0x9ca   :  { %v2996_v53 = vpop.eup %2995 }
 0x9cb   :  { %v825_v54 = vadd.f32 1.0, %v2996_v53 }
 0x9cd   :  { %2997 = vrcp.f32 %v825_v54 }
 0x9da   :  { %v2998_v55 = vpop.eup %2997 }
 0x9db   :  { %v839_v61 = vsub.f32 1.0, %v2998_v55  ;;  %v845_v1 = vmul.f32 %v2998_v55, %v745_v46 }
 0xa2b   :  { %v830_v56 = vpop.permute.xlu1 %829 }
 0xa2c   :  { %v832_v57 = vmul.f32 %v2998_v55, %v830_v56 }
 0xa2e   :  { %834 = vrot.lane.b32.xlu0 %v832_v57, %s3070_s22 }
 0xa38   :  { %v851_v63 = vpop.permute.xlu1 %850 }
 0xa39   :  { %vm852_vm7 = vcmp.eq.s32.totalorder %v851_v63, 1 }
 0xaa0   :  { %v835_v58 = vpop.permute.xlu0 %834 }
 0xaa1   :  { %v837_v59 = vadd.f32 %v835_v58, %v3332_v6 }
 0xaa3   :  { %2999 = vtanh.f32 %v837_v59 }
 0xab0   :  { %v3000_v60 = vpop.eup %2999 }
 0xab1   :  { %841 = vrot.lane.b32.xlu0 %v3000_v60, %s3071_s2 }
 0xb23   :  { %v842_v62 = vpop.permute.xlu0 %841 }
 0xb24   :  { %v844_v4 = vmul.f32 %v842_v62, %v839_v61 }
 0xb26   :  { %v846_v5 = vadd.f32 %v845_v1, %v844_v4  ;;  %v1172_v4 = vsel %vm1171_vm12, 1, %v3069_v3 }
 0xb28   :  { %v853_v7 = vsel %vm852_vm7, %v846_v5, %v745_v46 }
 0xb29   :  { %855 = vrot.lane.b32.xlu1 %v853_v7, %s3071_s2 }
 0xb9b   :  { %v856_v9 = vpop.permute.xlu1 %855 }
 0xb9c   :  { %2784 = vmatmul.mubr.msk.f32.vlgmr.msra.gmra.mxu1 %vm134_vm1, %v856_v9 }
 0xb9d   :  { %2798 = vmatpush3.msra.mxu1 %v3248_v23  ;;  %2805 = vmatprep.mubr.msk.f32.mxu1 %vm3068_vm0, %v3067_v0 }
 0xb9e   :  { %2799 = vmatprep.subr.mxu1 %v3067_v0 }
 0xb9f   :  { %2800 = vmatpush3.msra.mxu1 %v3255_v24 }
 0xba0   :  { %2801 = vmatprep.subr.mxu1 %v3067_v0 }
 0xba1   :  { %2802 = vmatpush3.msra.mxu1 %v3262_v26 }
 0xba2   :  { %2803 = vmatprep.subr.mxu1 %v3067_v0 }
 0xba3   :  { %2804 = vmatpush3.msra.mxu1 %v3271_v29 }
 0xba4   :  { %2819 = vmatprep.subr.mxu1 %v3067_v0 }
 0xc5c   :  { %v925_v6 = vpop.f32.mrf.mxu1 }
 0xc5d   :  { %v926_v11 = vadd.f32 %v3349_v20, %v925_v6 }
 0xc5e   :  { %v2785_v13 = vpop.f32.mrf.mxu1 }
 0xc5f   :  { %937 = vrot.lane.b32.xlu0 %v926_v11, %s3070_s22  ;;  %v929_v17 = vadd.f32 %v926_v11, %v3338_v12 }
 0xc61   :  { %v2489_v2 = vmul.f32 -1.442695, %v929_v17 }
 0xc63   :  { %958 = vperm.xlu0 %2975, %v956_v15   ;;  %3001 = vpow2.f32 %v2489_v2 }
 0xc70   :  { %v3002_v19 = vpop.eup %3001 }
 0xc71   :  { %v933_v25 = vadd.f32 1.0, %v3002_v19 }
 0xc73   :  { %3003 = vrcp.f32 %v933_v25 }
 0xc80   :  { %v3004_v28 = vpop.eup %3003 }
 0xc81   :  { %v947_v35 = vsub.f32 1.0, %v3004_v28  ;;  %v953_v38 = vmul.f32 %v3004_v28, %v853_v7 }
 0xcd1   :  { %v938_v30 = vpop.permute.xlu0 %937 }
 0xcd2   :  { %v940_v31 = vmul.f32 %v3004_v28, %v938_v30 }
 0xcd4   :  { %942 = vrot.lane.b32.xlu1 %v940_v31, %s3070_s22 }
 0xcde   :  { %v959_v37 = vpop.permute.xlu0 %958 }
 0xcdf   :  { %vm960_vm9 = vcmp.eq.s32.totalorder %v959_v37, 1  ;;  %v1280_v37 = vsel %vm1279_vm14, 1, %v3069_v3 }
 0xd46   :  { %v943_v32 = vpop.permute.xlu1 %942 }
 0xd47   :  { %v945_v33 = vadd.f32 %v943_v32, %v3338_v12 }
 0xd49   :  { %3005 = vtanh.f32 %v945_v33 }
 0xd56   :  { %v3006_v34 = vpop.eup %3005 }
 0xd57   :  { %949 = vrot.lane.b32.xlu1 %v3006_v34, %s3071_s2 }
 0xdc9   :  { %v950_v36 = vpop.permute.xlu1 %949 }
 0xdca   :  { %v952_v39 = vmul.f32 %v950_v36, %v947_v35 }
 0xdcc   :  { %v954_v40 = vadd.f32 %v953_v38, %v952_v39 }
 0xdce   :  { %v961_v41 = vsel %vm960_vm9, %v954_v40, %v853_v7 }
 0xdcf   :  { %963 = vrot.lane.b32.xlu0 %v961_v41, %s3071_s2 }
 0xe41   :  { %v964_v42 = vpop.permute.xlu0 %963 }
 0xe42   :  { %2795 = vmatmul.mubr.msk.f32.vlgmr.msra.gmra.mxu0 %vm134_vm1, %v964_v42 }
 0xe43   :  { %2809 = vmatpush3.msra.mxu0 %v3248_v23  ;;  %2816 = vmatprep.mubr.msk.f32.mxu0 %vm3068_vm0, %v3067_v0 }
 0xe44   :  { %2810 = vmatprep.subr.mxu0 %v3067_v0 }
 0xe45   :  { %2811 = vmatpush3.msra.mxu0 %v3255_v24 }
 0xe46   :  { %2812 = vmatprep.subr.mxu0 %v3067_v0 }
 0xe47   :  { %2813 = vmatpush3.msra.mxu0 %v3262_v26 }
 0xe48   :  { %2814 = vmatprep.subr.mxu0 %v3067_v0 }
 0xe49   :  { %2815 = vmatpush3.msra.mxu0 %v3271_v29 }
 0xe4a   :  { %2830 = vmatprep.subr.mxu0 %v3067_v0 }
 0xf02   :  { %v1033_v12 = vpop.f32.mrf.mxu0 }
 0xf03   :  { %v1034_v43 = vadd.f32 %v3349_v20, %v1033_v12 }
 0xf04   :  { %v2796_v44 = vpop.f32.mrf.mxu0 }
 0xf05   :  { %1045 = vrot.lane.b32.xlu1 %v1034_v43, %s3070_s22  ;;  %v1037_v46 = vadd.f32 %v1034_v43, %v3336_v10 }
 0xf07   :  { %v2491_v47 = vmul.f32 -1.442695, %v1037_v46 }
 0xf09   :  { %1066 = vperm.xlu1 %2976, %v1064_v45   ;;  %3007 = vpow2.f32 %v2491_v47 }
 0xf16   :  { %v3008_v8 = vpop.eup %3007 }
 0xf17   :  { %v1041_v48 = vadd.f32 1.0, %v3008_v8 }
 0xf19   :  { %3009 = vrcp.f32 %v1041_v48 }
 0xf26   :  { %v3010_v49 = vpop.eup %3009 }
 0xf27   :  { %v1055_v55 = vsub.f32 1.0, %v3010_v49  ;;  %v1061_v58 = vmul.f32 %v3010_v49, %v961_v41 }
 0xf77   :  { %v1046_v50 = vpop.permute.xlu1 %1045 }
 0xf78   :  { %v1048_v51 = vmul.f32 %v3010_v49, %v1046_v50 }
 0xf7a   :  { %1050 = vrot.lane.b32.xlu0 %v1048_v51, %s3070_s22 }
 0xf84   :  { %v1067_v57 = vpop.permute.xlu1 %1066 }
 0xf85   :  { %vm1068_vm11 = vcmp.eq.s32.totalorder %v1067_v57, 1 }
 0xfec   :  { %v1051_v52 = vpop.permute.xlu0 %1050 }
 0xfed   :  { %v1053_v53 = vadd.f32 %v1051_v52, %v3336_v10 }
 0xfef   :  { %3011 = vtanh.f32 %v1053_v53  ;;  %v1388_v53 = vsel %vm1387_vm2, 1, %v3069_v3 }
 0xffc   :  { %v3012_v54 = vpop.eup %3011 }
 0xffd   :  { %1057 = vrot.lane.b32.xlu0 %v3012_v54, %s3071_s2 }
0x106f   :  { %v1058_v56 = vpop.permute.xlu0 %1057 }
0x1070   :  { %v1060_v59 = vmul.f32 %v1058_v56, %v1055_v55 }
0x1072   :  { %v1062_v60 = vadd.f32 %v1061_v58, %v1060_v59 }
0x1074   :  { %v1069_v61 = vsel %vm1068_vm11, %v1062_v60, %v961_v41 }
0x1075   :  { %1071 = vrot.lane.b32.xlu1 %v1069_v61, %s3071_s2 }
0x10e7   :  { %v1072_v62 = vpop.permute.xlu1 %1071 }
0x10e8   :  { %2806 = vmatmul.mubr.msk.f32.vlgmr.msra.gmra.mxu1 %vm134_vm1, %v1072_v62 }
0x10e9   :  { %2820 = vmatpush3.msra.mxu1 %v3248_v23  ;;  %2827 = vmatprep.mubr.msk.f32.mxu1 %vm3068_vm0, %v3067_v0 }
0x10ea   :  { %2821 = vmatprep.subr.mxu1 %v3067_v0 }
0x10eb   :  { %2822 = vmatpush3.msra.mxu1 %v3255_v24 }
0x10ec   :  { %2823 = vmatprep.subr.mxu1 %v3067_v0 }
0x10ed   :  { %2824 = vmatpush3.msra.mxu1 %v3262_v26 }
0x10ee   :  { %2825 = vmatprep.subr.mxu1 %v3067_v0 }
0x10ef   :  { %2826 = vmatpush3.msra.mxu1 %v3271_v29 }
0x10f0   :  { %2892 = vmatprep.subr.mxu1 %v3067_v0 }
0x11a8   :  { %v1141_v10 = vpop.f32.mrf.mxu1 }
0x11a9   :  { %v1142_v63 = vadd.f32 %v3349_v20, %v1141_v10 }
0x11aa   :  { %v2807_v1 = vpop.f32.mrf.mxu1 }
0x11ab   :  { %1153 = vrot.lane.b32.xlu0 %v1142_v63, %s3070_s22  ;;  %v1145_v5 = vadd.f32 %v1142_v63, %v3342_v16 }
0x11ad   :  { %v2493_v7 = vmul.f32 -1.442695, %v1145_v5 }
0x11af   :  { %1174 = vperm.xlu0 %2975, %v1172_v4   ;;  %3013 = vpow2.f32 %v2493_v7 }
0x11bc   :  { %v3014_v9 = vpop.eup %3013 }
0x11bd   :  { %v1149_v6 = vadd.f32 1.0, %v3014_v9 }
0x11bf   :  { %3015 = vrcp.f32 %v1149_v6 }
0x11cc   :  { %v3016_v11 = vpop.eup %3015 }
0x11cd   :  { %v1163_v25 = vsub.f32 1.0, %v3016_v11  ;;  %v1169_v31 = vmul.f32 %v3016_v11, %v1069_v61 }
0x121d   :  { %v1154_v13 = vpop.permute.xlu0 %1153 }
0x121e   :  { %v1156_v15 = vmul.f32 %v3016_v11, %v1154_v13 }
0x1220   :  { %1158 = vrot.lane.b32.xlu1 %v1156_v15, %s3070_s22 }
0x122a   :  { %v1175_v30 = vpop.permute.xlu0 %1174 }
0x122b   :  { %vm1176_vm13 = vcmp.eq.s32.totalorder %v1175_v30, 1  ;;  %v1540_v30 = vld [vmem:[%s3818_s8 + $0x18] sm:$0xff] }
0x1292   :  { %v1159_v17 = vpop.permute.xlu1 %1158 }
0x1293   :  { %v1161_v2 = vadd.f32 %v1159_v17, %v3342_v16  ;;  %v1496_v17 = vsel %vm1495_vm4, 1, %v3069_v3  ;;  %v1545_v3 = vld [vmem:[%s3817_s9] sm:$0xff] }
0x1295   :  { %3017 = vtanh.f32 %v1161_v2  ;;  %v1548_v2 = vld [vmem:[%s3817_s9 + $0x18] sm:$0xff] }
0x12a2   :  { %v3018_v19 = vpop.eup %3017 }
0x12a3   :  { %1165 = vrot.lane.b32.xlu1 %v3018_v19, %s3071_s2  ;;  %v1547_v19 = vld [vmem:[%s3817_s9 + $0x10] sm:$0xff] }
0x1315   :  { %v1166_v28 = vpop.permute.xlu1 %1165 }
0x1316   :  { %v1168_v32 = vmul.f32 %v1166_v28, %v1163_v25  ;;  %v1538_v25 = vld [vmem:[%s3818_s8 + $0x8] sm:$0xff]  ;;  %v1539_v28 = vld [vmem:[%s3818_s8 + $0x10] sm:$0xff] }
0x1318   :  { %v1170_v33 = vadd.f32 %v1169_v31, %v1168_v32  ;;  %v1541_v31 = vld [vmem:[%s3818_s8 + $0x20] sm:$0xff]  ;;  %v1542_v32 = vld [vmem:[%s3818_s8 + $0x28] sm:$0xff] }
0x131a   :  { %v1177_v34 = vsel %vm1176_vm13, %v1170_v33, %v1069_v61  ;;  %v1543_v33 = vld [vmem:[%s3818_s8 + $0x30] sm:$0xff] }
0x131b   :  { %1179 = vrot.lane.b32.xlu0 %v1177_v34, %s3071_s2 }
0x138d   :  { %v1180_v35 = vpop.permute.xlu0 %1179 }
0x138e   :  { %2817 = vmatmul.mubr.msk.f32.vlgmr.msra.gmra.mxu0 %vm134_vm1, %v1180_v35 }
0x138f   :  { %2831 = vmatpush3.msra.mxu0 %v3248_v23  ;;  %2838 = vmatprep.mubr.msk.f32.mxu0 %vm3068_vm0, %v3067_v0 }
0x1390   :  { %2832 = vmatprep.subr.mxu0 %v3067_v0 }
0x1391   :  { %2833 = vmatpush3.msra.mxu0 %v3255_v24 }
0x1392   :  { %2834 = vmatprep.subr.mxu0 %v3067_v0 }
0x1393   :  { %2835 = vmatpush3.msra.mxu0 %v3262_v26 }
0x1394   :  { %2836 = vmatprep.subr.mxu0 %v3067_v0 }
0x1395   :  { %2837 = vmatpush3.msra.mxu0 %v3271_v29 }
0x1396   :  { %2841 = vmatprep.subr.mxu0 %v1548_v2 }
0x144e   :  { %v1249_v16 = vpop.f32.mrf.mxu0 }
0x144f   :  { %v1250_v36 = vadd.f32 %v3349_v20, %v1249_v16 }
0x1450   :  { %v2818_v23 = vpop.f32.mrf.mxu0 }
0x1451   :  { %1261 = vrot.lane.b32.xlu1 %v1250_v36, %s3070_s22  ;;  %v1253_v24 = vadd.f32 %v1250_v36, %v3340_v14 }
0x1453   :  { %v2495_v38 = vmul.f32 -1.442695, %v1253_v24 }
0x1455   :  { %1282 = vperm.xlu1 %2976, %v1280_v37   ;;  %3019 = vpow2.f32 %v2495_v38 }
0x1462   :  { %v3020_v26 = vpop.eup %3019 }
0x1463   :  { %v1257_v39 = vadd.f32 1.0, %v3020_v26 }
0x1465   :  { %3021 = vrcp.f32 %v1257_v39 }
0x1472   :  { %v3022_v40 = vpop.eup %3021 }
0x1473   :  { %v1271_v44 = vsub.f32 1.0, %v3022_v40  ;;  %v1277_v47 = vmul.f32 %v3022_v40, %v1177_v34 }
0x14c3   :  { %v1262_v29 = vpop.permute.xlu1 %1261 }
0x14c4   :  { %v1264_v41 = vmul.f32 %v3022_v40, %v1262_v29 }
0x14c6   :  { %1266 = vrot.lane.b32.xlu0 %v1264_v41, %s3070_s22 }
0x14d0   :  { %v1283_v46 = vpop.permute.xlu1 %1282 }
0x14d1   :  { %vm1284_vm15 = vcmp.eq.s32.totalorder %v1283_v46, 1  ;;  %v1502_v46 = vld [vmem:[%s3819_s1] sm:$0xff] }
0x1538   :  { %v1267_v42 = vpop.permute.xlu0 %1266 }
0x1539   :  { %v1269_v12 = vadd.f32 %v1267_v42, %v3340_v14 }
0x153b   :  { %3023 = vtanh.f32 %v1269_v12 }
0x1548   :  { %v3024_v43 = vpop.eup %3023 }
0x1549   :  { %1273 = vrot.lane.b32.xlu0 %v3024_v43, %s3071_s2 }
0x15bb   :  { %v1274_v45 = vpop.permute.xlu0 %1273 }
0x15bc   :  { %v1276_v8 = vmul.f32 %v1274_v45, %v1271_v44 }
0x15be   :  { %v1278_v48 = vadd.f32 %v1277_v47, %v1276_v8  ;;  %v3589_v47 = vld [vmem:[%s3820_s10 + $0x18] sm:$0xff]  ;;  %v3594_v8 = vld [vmem:[%s3820_s10 + $0x10] sm:$0xff] }
0x15c0   :  { %v1285_v49 = vsel %vm1284_vm15, %v1278_v48, %v1177_v34  ;;  %v1544_v34 = vld [vmem:[%s3818_s8 + $0x38] sm:$0xff]  ;;  %v3601_v48 = vld [vmem:[%s3820_s10 + $0x8] sm:$0xff] }
0x15c1   :  { %1287 = vrot.lane.b32.xlu1 %v1285_v49, %s3071_s2 }
0x1633   :  { %v1288_v50 = vpop.permute.xlu1 %1287 }
0x1634   :  { %2828 = vmatmul.mubr.msk.f32.vlgmr.msra.gmra.mxu1 %vm134_vm1, %v1288_v50 }
0x1635   :  { %2900 = vmatprep.mubr.msk.f32.mxu1 %vm3068_vm0, %v3067_v0  ;;  %2893 = vmatpush3.msra.mxu1 %v3589_v47 }
0x1636   :  { %2894 = vmatprep.subr.mxu1 %v3067_v0 }
0x1637   :  { %2895 = vmatpush3.msra.mxu1 %v3594_v8 }
0x1638   :  { %2896 = vmatprep.subr.mxu1 %v3067_v0 }
0x1639   :  { %2897 = vmatpush3.msra.mxu1 %v3601_v48 }
0x163a   :  { %2898 = vmatprep.subr.mxu1 %v3067_v0 }
0x16f4   :  { %v1357_v14 = vpop.f32.mrf.mxu1 }
0x16f5   :  { %v1358_v51 = vadd.f32 %v3349_v20, %v1357_v14 }
0x16f6   :  { %v2829_v52 = vpop.f32.mrf.mxu1 }
0x16f7   :  { %1369 = vrot.lane.b32.xlu0 %v1358_v51, %s3070_s22  ;;  %v1361_v54 = vadd.f32 %v1358_v51, %v3356_v22 }
0x16f9   :  { %v2497_v55 = vmul.f32 -1.442695, %v1361_v54 }
0x16fb   :  { %1390 = vperm.xlu0 %2975, %v1388_v53   ;;  %3025 = vpow2.f32 %v2497_v55 }
0x1708   :  { %v3026_v56 = vpop.eup %3025 }
0x1709   :  { %v1365_v57 = vadd.f32 1.0, %v3026_v56 }
0x170b   :  { %3027 = vrcp.f32 %v1365_v57 }
0x1718   :  { %v3028_v58 = vpop.eup %3027 }
0x1719   :  { %v1379_v63 = vsub.f32 1.0, %v3028_v58  ;;  %v1385_v5 = vmul.f32 %v3028_v58, %v1285_v49 }
0x1769   :  { %v1370_v59 = vpop.permute.xlu0 %1369 }
0x176a   :  { %v1372_v60 = vmul.f32 %v3028_v58, %v1370_v59 }
0x176c   :  { %1374 = vrot.lane.b32.xlu1 %v1372_v60, %s3070_s22 }
0x1776   :  { %v1391_v4 = vpop.permute.xlu0 %1390 }
0x1777   :  { %vm1392_vm3 = vcmp.eq.s32.totalorder %v1391_v4, 1 }
0x17de   :  { %v1375_v61 = vpop.permute.xlu1 %1374 }
0x17df   :  { %v1377_v62 = vadd.f32 %v1375_v61, %v3356_v22  ;;  %v3644_v61 = vld [vmem:[%s3821_s12] ss:$0 sm:$0xff] }
0x17e1   :  { %3029 = vtanh.f32 %v1377_v62 }
0x17ee   :  { %v3030_v10 = vpop.eup %3029 }
0x17ef   :  { %1381 = vrot.lane.b32.xlu1 %v3030_v10, %s3071_s2 }
0x1861   :  { %v1382_v1 = vpop.permute.xlu1 %1381 }
0x1862   :  { %v1384_v7 = vmul.f32 %v1382_v1, %v1379_v63  ;;  %v3651_v1 = vld [vmem:[%s3822_s11] ss:$0 sm:$0xff] }
0x1864   :  { %v1386_v9 = vadd.f32 %v1385_v5, %v1384_v7 }
0x1866   :  { %v3515_v6 = vsel %vm1392_vm3, %v1386_v9, %v1285_v49  ;;  %v3608_v49 = vld [vmem:[%s3820_s10] sm:$0xff] }
0x1867   :  { %1395 = vrot.lane.b32.xlu0 %v3515_v6, %s3071_s2  ;;  %2899 = vmatpush3.msra.mxu1 %v3608_v49 }
0x1868   :  { %2903 = vmatprep.subr.mxu1 %v3067_v0 }
0x18d9   :  { %v1396_v11 = vpop.permute.xlu0 %1395 }
0x18da   :  { %2839 = vmatmul.mubr.msk.f32.vlgmr.msra.gmra.mxu0 %vm134_vm1, %v1396_v11 }
0x18db   :  { %2842 = vmatpush3.msra.mxu0 %v1548_v2 }
0x18dc   :  { %2843 = vmatprep.subr.mxu0 %v1547_v19 }
0x18dd   :  { %2844 = vmatpush3.msra.mxu0 %v1547_v19  ;;  %v1503_v19 = vld [vmem:[%s3819_s1 + $0x8] sm:$0xff] }
0x18de   :  { %2845 = vmatprep.subr.mxu0 %v1546_v21 }
0x18df   :  { %2846 = vmatpush3.msra.mxu0 %v1546_v21 }
0x18e0   :  { %2847 = vmatprep.subr.mxu0 %v1545_v3 }
0x18e1   :  { %2848 = vmatpush3.msra.mxu0 %v1545_v3 }
0x18e2   :  { %2861 = vmatprep.subr.mxu0 %v3067_v0 }
0x199a   :  { %v1465_v22 = vpop.f32.mrf.mxu0 }
0x199b   :  { %v1466_v13 = vadd.f32 %v3349_v20, %v1465_v22  ;;  %v1537_v20 = vld [vmem:[%s3818_s8] sm:$0xff] }
0x199c   :  { %v2840_v15 = vpop.f32.mrf.mxu0  ;;  %2849 = vmatprep.mubr.msk.f32.mxu0 %vm134_vm1, %v1537_v20 }
0x199d   :  { %1477 = vrot.lane.b32.xlu1 %v1466_v13, %s3070_s22  ;;  %2850 = vmatmul.mubr.msk.f32.vlgmr.msra.gmra.mxu0 %vm134_vm1, %v1538_v25  ;;  %v1469_v35 = vadd.f32 %v1466_v13, %v3344_v18 }
0x199e   :  { %2852 = vmatprep.mubr.msk.f32.mxu0 %vm134_vm1, %v1539_v28 }
0x199f   :  { %v2499_v16 = vmul.f32 -1.442695, %v1469_v35 }
0x19a1   :  { %1498 = vperm.xlu1 %2976, %v1496_v17   ;;  %2853 = vmatmul.mubr.msk.f32.gmra.mxu0 %vm134_vm1, %v1540_v30  ;;  %3031 = vpow2.f32 %v2499_v16 }
0x19a2   :  { %2855 = vmatprep.mubr.msk.f32.mxu0 %vm134_vm1, %v1541_v31 }
0x19a5   :  { %2856 = vmatmul.mubr.msk.f32.gmra.mxu0 %vm134_vm1, %v1542_v32 }
0x19a6   :  { %2858 = vmatprep.mubr.msk.f32.mxu0 %vm134_vm1, %v1543_v33 }
0x19a9   :  { %2859 = vmatmul.mubr.msk.f32.gmra.mxu0 %vm134_vm1, %v1544_v34 }
0x19aa   :  { %2877 = vmatprep.mubr.msk.f32.mxu0 %vm3068_vm0, %v3067_v0 }
0x19ae   :  { %v3032_v36 = vpop.eup %3031 }
0x19af   :  { %v1473_v23 = vadd.f32 1.0, %v3032_v36 }
0x19b1   :  { %3033 = vrcp.f32 %v1473_v23 }
0x19be   :  { %v3034_v37 = vpop.eup %3033 }
0x19bf   :  { %v1487_v50 = vsub.f32 1.0, %v3034_v37  ;;  %v1493_v52 = vmul.f32 %v3034_v37, %v3515_v6 }
0x1a0f   :  { %v1478_v24 = vpop.permute.xlu1 %1477 }
0x1a10   :  { %v1480_v38 = vmul.f32 %v3034_v37, %v1478_v24 }
0x1a12   :  { %1482 = vrot.lane.b32.xlu0 %v1480_v38, %s3070_s22 }
0x1a1c   :  { %v1499_v51 = vpop.permute.xlu1 %1498 }
0x1a1d   :  { %vm1500_vm5 = vcmp.eq.s32.totalorder %v1499_v51, 1 }
0x1a5d   :  { %v2851_v26 = vpop.f32.mrf.mxu0 }
0x1a5f   :  { %v1639_v39 = vpop.f32.mrf.mxu0 }
0x1a61   :  { %v2854_v40 = vpop.f32.mrf.mxu0 }
0x1a63   :  { %v1649_v29 = vpop.f32.mrf.mxu0 }
0x1a65   :  { %v2857_v41 = vpop.f32.mrf.mxu0 }
0x1a67   :  { %v1659_v42 = vpop.f32.mrf.mxu0 }
0x1a69   :  { %v2860_v44 = vpop.f32.mrf.mxu0 }
0x1a6a   :  { %2862 = vmatpush3.msra.mxu0 %v2860_v44 }
0x1a6b   :  { %v1669_v45 = vpop.f32.mrf.mxu0  ;;  %2863 = vmatprep.subr.mxu0 %v3067_v0 }
0x1a6c   :  { %2864 = vmatpush3.msra.mxu0 %v1669_v45 }
0x1a6d   :  { %2865 = vmatprep.subr.mxu0 %v3067_v0 }
0x1a6e   :  { %2866 = vmatpush3.msra.mxu0 %v2857_v41  ;;  %v1504_v41 = vld [vmem:[%s3819_s1 + $0x10] sm:$0xff] }
0x1a6f   :  { %2867 = vmatprep.subr.mxu0 %v3067_v0 }
0x1a70   :  { %2868 = vmatpush3.msra.mxu0 %v1659_v42  ;;  %v1506_v42 = vld [vmem:[%s3819_s1 + $0x20] sm:$0xff] }
0x1a71   :  { %2869 = vmatprep.subr.mxu0 %v3067_v0 }
0x1a72   :  { %2870 = vmatpush3.msra.mxu0 %v2854_v40 }
0x1a73   :  { %2871 = vmatprep.subr.mxu0 %v3067_v0 }
0x1a74   :  { %2872 = vmatpush3.msra.mxu0 %v1649_v29 }
0x1a75   :  { %2873 = vmatprep.subr.mxu0 %v3067_v0 }
0x1a76   :  { %2874 = vmatpush3.msra.mxu0 %v2851_v26 }
0x1a77   :  { %2875 = vmatprep.subr.mxu0 %v3067_v0 }
0x1a78   :  { %2876 = vmatpush3.msra.mxu0 %v1639_v39 }
0x1a79   :  { %2914 = vmatprep.subr.mxu0 %v3067_v0 }
0x1a84   :  { %v1483_v12 = vpop.permute.xlu0 %1482 }
0x1a85   :  { %v1485_v43 = vadd.f32 %v1483_v12, %v3344_v18 }
0x1a87   :  { %3035 = vtanh.f32 %v1485_v43 }
0x1a94   :  { %v3036_v18 = vpop.eup %3035 }
0x1a95   :  { %1489 = vrot.lane.b32.xlu0 %v3036_v18, %s3071_s2 }
0x1a99   :  { %1508 = vperm.xlu0 %2975, %v1502_v46   ;;  %v1505_v46 = vld [vmem:[%s3819_s1 + $0x18] sm:$0xff] }
0x1b07   :  { %v1490_v14 = vpop.permute.xlu0 %1489 }
0x1b08   :  { %v1492_v53 = vmul.f32 %v1490_v14, %v1487_v50 }
0x1b0a   :  { %v1494_v54 = vadd.f32 %v1493_v52, %v1492_v53 }
0x1b0c   :  { %v1501_v55 = vsel %vm1500_vm5, %v1494_v54, %v3515_v6 }
0x1b0d   :  { %1803 = vrot.lane.b32.xlu1 %v1501_v55, %s3071_s2 }
0x1b14   :  { %v1509_v56 = vpop.permute.xlu0 %1508 }
0x1b15   :  { %vm1522_vm7 = vcmp.eq.s32.totalorder %v1509_v56, %v3266_v27 }
0x1b16   :  { %v2500_v57 = vsel %vm1522_vm7, 1.0, %v3067_v0 }
0x1b17   :  { %2878 = vmatmul.mubr.msk.f32.vlgmr.msra.gmra.mxu0 %vm1685_vm6, %v2500_v57 }
0x1b18   :  { %2880 = vmatprep.mubr.msk.f32.mxu0 %vm3068_vm0, %v3067_v0  ;;  %2915 = vmatpush3.msra.mxu0 %v3589_v47 }
0x1b19   :  { %2916 = vmatprep.subr.mxu0 %v3067_v0 }
0x1b1a   :  { %2917 = vmatpush3.msra.mxu0 %v3594_v8 }
0x1b1b   :  { %2918 = vmatprep.subr.mxu0 %v3067_v0 }
0x1b1c   :  { %2919 = vmatpush3.msra.mxu0 %v3601_v48 }
0x1b1d   :  { %2920 = vmatprep.subr.mxu0 %v3067_v0 }
0x1b1e   :  { %2921 = vmatpush3.msra.mxu0 %v3608_v49 }
0x1b1f   :  { %2936 = vmatprep.subr.mxu0 %v3067_v0 }
0x1b7f   :  { %v1804_v58 = vpop.permute.xlu1 %1803 }
0x1b80   :  { %2901 = vmatmul.mubr.msk.f32.vlgmr.msra.gmra.mxu1 %vm134_vm1, %v1804_v58 }
0x1b81   :  { %2904 = vmatpush3.msra.mxu1 %v3589_v47  ;;  %2911 = vmatprep.mubr.msk.f32.mxu1 %vm3068_vm0, %v3067_v0 }
0x1b82   :  { %2905 = vmatprep.subr.mxu1 %v3067_v0 }
0x1b83   :  { %2906 = vmatpush3.msra.mxu1 %v3594_v8 }
0x1b84   :  { %2907 = vmatprep.subr.mxu1 %v3067_v0 }
0x1b85   :  { %2908 = vmatpush3.msra.mxu1 %v3601_v48 }
0x1b86   :  { %2909 = vmatprep.subr.mxu1 %v3067_v0 }
0x1b87   :  { %2910 = vmatpush3.msra.mxu1 %v3608_v49 }
0x1b88   :  { %2925 = vmatprep.subr.mxu1 %v3067_v0 }
0x1bd7   :  { %v1767_v59 = vpop.f32.mrf.mxu0 }
0x1bd8   :  { %v1768_v4 = vadd.f32 %v3651_v1, %v1767_v59 }
0x1bd9   :  { %v2879_v60 = vpop.f32.mrf.mxu0 }
0x1c40   :  { %v1873_v62 = vpop.f32.mrf.mxu1 }
0x1c41   :  { %v1874_v10 = vadd.f32 %v3644_v61, %v1873_v62 }
0x1c42   :  { %v2902_v63 = vpop.f32.mrf.mxu1 }
0x1c43   :  { %1885 = vrot.lane.b32.xlu1 %v1874_v10, %s3070_s22  ;;  %v1877_v5 = vadd.f32 %v1874_v10, %v1768_v4 }
0x1c45   :  { %v2521_v7 = vmul.f32 -1.442695, %v1877_v5 }
0x1c47   :  { %3037 = vpow2.f32 %v2521_v7 }
0x1c54   :  { %v3038_v9 = vpop.eup %3037 }
0x1c55   :  { %v1881_v6 = vadd.f32 1.0, %v3038_v9 }
0x1c57   :  { %3039 = vrcp.f32 %v1881_v6 }
0x1c64   :  { %v3040_v11 = vpop.eup %3039 }
0x1c65   :  { %v1895_v20 = vsub.f32 1.0, %v3040_v11  ;;  %v1901_v3 = vmul.f32 %v3040_v11, %v1501_v55 }
0x1cb5   :  { %v1886_v22 = vpop.permute.xlu1 %1885 }
0x1cb6   :  { %v1888_v13 = vmul.f32 %v3040_v11, %v1886_v22 }
0x1cb8   :  { %1890 = vrot.lane.b32.xlu0 %v1888_v13, %s3070_s22 }
0x1d2a   :  { %v1891_v15 = vpop.permute.xlu0 %1890 }
0x1d2b   :  { %v1893_v17 = vadd.f32 %v1891_v15, %v1768_v4 }
0x1d2d   :  { %3041 = vtanh.f32 %v1893_v17 }
0x1d3a   :  { %v3042_v2 = vpop.eup %3041 }
0x1d3b   :  { %1897 = vrot.lane.b32.xlu1 %v3042_v2, %s3071_s2 }
0x1d3f   :  { %1511 = vperm.xlu1 %2976, %v1503_v19  }
0x1dad   :  { %v1898_v21 = vpop.permute.xlu1 %1897 }
0x1dae   :  { %v1900_v25 = vmul.f32 %v1898_v21, %v1895_v20 }
0x1db0   :  { %v1902_v28 = vadd.f32 %v1901_v3, %v1900_v25  ;;  %v2328_v25 = vld [vmem:[%s3823_s13 + $0x18] sm:$0xff] }
0x1db2   :  { %1904 = vrot.lane.b32.xlu0 %v1902_v28, %s3071_s2 }
0x1dba   :  { %v1512_v30 = vpop.permute.xlu1 %1511 }
0x1dbb   :  { %vm1523_vm8 = vcmp.eq.s32.totalorder %v1512_v30, %v3266_v27  ;;  %v2327_v30 = vld [vmem:[%s3823_s13 + $0x10] sm:$0xff] }
0x1dbc   :  { %v2501_v31 = vsel %vm1523_vm8, 1.0, %v3067_v0 }
0x1dbd   :  { %2881 = vmatmul.mubr.msk.f32.gmra.mxu0 %vm1685_vm6, %v2501_v31  ;;  %v2326_v31 = vld [vmem:[%s3823_s13 + $0x8] sm:$0xff] }
0x1dbe   :  { %2883 = vmatprep.mubr.msk.f32.mxu0 %vm3068_vm0, %v3067_v0 }
0x1e24   :  { %v1905_v32 = vpop.permute.xlu0 %1904 }
0x1e25   :  { %1907 = vst.msk [vmem:[#allocation2] sm:$0xff] %vm134_vm1, %v1905_v32  ;;  %2912 = vmatmul.mubr.msk.f32.vlgmr.msra.gmra.mxu1 %vm134_vm1, %v1905_v32  ;;  %v2325_v32 = vld [vmem:[%s3823_s13] sm:$0xff] }
0x1e26   :  { %2926 = vmatpush3.msra.mxu1 %v3589_v47  ;;  %2933 = vmatprep.mubr.msk.f32.mxu1 %vm3068_vm0, %v3067_v0 }
0x1e27   :  { %2927 = vmatprep.subr.mxu1 %v3067_v0 }
0x1e28   :  { %2928 = vmatpush3.msra.mxu1 %v3594_v8 }
0x1e29   :  { %2929 = vmatprep.subr.mxu1 %v3067_v0 }
0x1e2a   :  { %2930 = vmatpush3.msra.mxu1 %v3601_v48 }
0x1e2b   :  { %2931 = vmatprep.subr.mxu1 %v3067_v0 }
0x1e2c   :  { %2932 = vmatpush3.msra.mxu1 %v3608_v49 }
0x1e2d   :  { %2947 = vmatprep.subr.mxu1 %v3067_v0 }
0x1e7d   :  { %v1772_v33 = vpop.f32.mrf.mxu0 }
0x1e7e   :  { %v1773_v23 = vadd.f32 %v3651_v1, %v1772_v33  ;;  %v2320_v33 = vld [vmem:[#allocation2] sm:$0xff] }
0x1e7f   :  { %v2882_v34 = vpop.f32.mrf.mxu0 }
0x1ee5   :  { %v1976_v35 = vpop.f32.mrf.mxu1 }
0x1ee6   :  { %v1977_v16 = vadd.f32 %v3644_v61, %v1976_v35 }
0x1ee7   :  { %v2913_v36 = vpop.f32.mrf.mxu1 }
0x1ee8   :  { %1988 = vrot.lane.b32.xlu0 %v1977_v16, %s3070_s22  ;;  %v1980_v37 = vadd.f32 %v1977_v16, %v1773_v23 }
0x1eea   :  { %v2523_v24 = vmul.f32 -1.442695, %v1980_v37  ;;  %v3768_v37 = vld [vmem:[%s3825_s14] ss:$0 sm:$0xff] }
0x1eec   :  { %3043 = vpow2.f32 %v2523_v24 }
0x1ef9   :  { %v3044_v38 = vpop.eup %3043 }
0x1efa   :  { %v1984_v26 = vadd.f32 1.0, %v3044_v38 }
0x1efc   :  { %3045 = vrcp.f32 %v1984_v26 }
0x1f09   :  { %v3046_v39 = vpop.eup %3045 }
0x1f0a   :  { %v1998_v50 = vsub.f32 1.0, %v3046_v39  ;;  %v2004_v51 = vmul.f32 %v3046_v39, %v1902_v28 }
0x1f5a   :  { %v1989_v40 = vpop.permute.xlu0 %1988 }
0x1f5b   :  { %v1991_v29 = vmul.f32 %v3046_v39, %v1989_v40 }
0x1f5d   :  { %1993 = vrot.lane.b32.xlu1 %v1991_v29, %s3070_s22 }
0x1f61   :  { %1514 = vperm.xlu1 %2976, %v1504_v41  }
0x1f65   :  { %1520 = vperm.xlu1 %2976, %v1506_v42  }
0x1fcf   :  { %v1994_v12 = vpop.permute.xlu1 %1993 }
0x1fd0   :  { %v1996_v43 = vadd.f32 %v1994_v12, %v1773_v23 }
0x1fd2   :  { %3047 = vtanh.f32 %v1996_v43 }
0x1fdc   :  { %v1515_v44 = vpop.permute.xlu1 %1514 }
0x1fdd   :  { %vm1524_vm9 = vcmp.eq.s32.totalorder %v1515_v44, %v3266_v27 }
0x1fde   :  { %v2502_v45 = vsel %vm1524_vm9, 1.0, %v3067_v0 }
0x1fdf   :  { %v3048_v18 = vpop.eup %3047  ;;  %2884 = vmatmul.mubr.msk.f32.gmra.mxu0 %vm1685_vm6, %v2502_v45 }
0x1fe0   :  { %2000 = vrot.lane.b32.xlu0 %v3048_v18, %s3071_s2  ;;  %2886 = vmatprep.mubr.msk.f32.mxu0 %vm3068_vm0, %v3067_v0  ;;  %v1521_v54 = vpop.permute.xlu1 %1520 }
0x1fe1   :  { %vm1526_vm11 = vcmp.eq.s32.totalorder %v1521_v54, %v3266_v27 }
0x1fe2   :  { %v2504_v57 = vsel %vm1526_vm11, 1.0, %v3067_v0 }
0x1fe4   :  { %1517 = vperm.xlu0 %2975, %v1505_v46  }
0x2052   :  { %v2001_v14 = vpop.permute.xlu0 %2000 }
0x2053   :  { %v2003_v52 = vmul.f32 %v2001_v14, %v1998_v50 }
0x2055   :  { %v2005_v53 = vadd.f32 %v2004_v51, %v2003_v52 }
0x2057   :  { %2007 = vrot.lane.b32.xlu0 %v2005_v53, %s3071_s2 }
0x205f   :  { %v1518_v55 = vpop.permute.xlu0 %1517 }
0x2060   :  { %vm1525_vm10 = vcmp.eq.s32.totalorder %v1518_v55, %v3266_v27 }
0x2061   :  { %v2503_v56 = vsel %vm1525_vm10, 1.0, %v3067_v0 }
0x2062   :  { %2887 = vmatmul.mubr.msk.f32.gmra.mxu0 %vm1685_vm6, %v2503_v56 }
0x2063   :  { %2889 = vmatprep.mubr.msk.f32.mxu0 %vm3068_vm0, %v3067_v0 }
0x2066   :  { %2890 = vmatmul.mubr.msk.f32.gmra.mxu0 %vm1685_vm6, %v2504_v57 }
0x2067   :  { %2922 = vmatprep.mubr.msk.f32.mxu0 %vm3068_vm0, %v3067_v0 }
0x209f   :  { %v1777_v58 = vpop.f32.mrf.mxu0 }
0x20a1   :  { %v2885_v59 = vpop.f32.mrf.mxu0 }
0x20c9   :  { %v2008_v60 = vpop.permute.xlu0 %2007 }
0x20ca   :  { %2010 = vst.msk [vmem:[#allocation2 + $0x8] sm:$0xff] %vm134_vm1, %v2008_v60  ;;  %2923 = vmatmul.mubr.msk.f32.vlgmr.msra.gmra.mxu0 %vm134_vm1, %v2008_v60 }
0x20cb   :  { %2937 = vmatpush3.msra.mxu0 %v3589_v47  ;;  %2944 = vmatprep.mubr.msk.f32.mxu0 %vm3068_vm0, %v3067_v0 }
0x20cc   :  { %2938 = vmatprep.subr.mxu0 %v3067_v0 }
0x20cd   :  { %2939 = vmatpush3.msra.mxu0 %v3594_v8  ;;  %v1778_v8 = vadd.f32 %v3651_v1, %v1777_v58 }
0x20ce   :  { %2940 = vmatprep.subr.mxu0 %v3067_v0 }
0x20cf   :  { %2941 = vmatpush3.msra.mxu0 %v3601_v48 }
0x20d0   :  { %2942 = vmatprep.subr.mxu0 %v3067_v0 }
0x20d1   :  { %2943 = vmatpush3.msra.mxu0 %v3608_v49  ;;  %v2321_v34 = vld [vmem:[#allocation2 + $0x8] sm:$0xff] }
0x2122   :  { %v3718_v27 = vpop.f32.mrf.mxu0 }
0x2123   :  { %v1783_v43 = vadd.f32 %v3651_v1, %v3718_v27 }
0x2124   :  { %v2888_v62 = vpop.f32.mrf.mxu0 }
0x2126   :  { %v3720_v10 = vpop.f32.mrf.mxu0 }
0x2128   :  { %v2891_v47 = vpop.f32.mrf.mxu0 }
0x218a   :  { %v2079_v63 = vpop.f32.mrf.mxu0 }
0x218b   :  { %v2080_v4 = vadd.f32 %v3644_v61, %v2079_v63 }
0x218c   :  { %v2924_v5 = vpop.f32.mrf.mxu0 }
0x218d   :  { %2091 = vrot.lane.b32.xlu1 %v2080_v4, %s3070_s22  ;;  %v2083_v7 = vadd.f32 %v2080_v4, %v1778_v8 }
0x218f   :  { %v2525_v48 = vmul.f32 -1.442695, %v2083_v7  ;;  %v1788_v7 = vadd.f32 %v3651_v1, %v3720_v10 }
0x2191   :  { %3049 = vpow2.f32 %v2525_v48 }
0x219e   :  { %v3050_v9 = vpop.eup %3049 }
0x219f   :  { %v2087_v6 = vadd.f32 1.0, %v3050_v9 }
0x21a1   :  { %3051 = vrcp.f32 %v2087_v6 }
0x21ae   :  { %v3052_v49 = vpop.eup %3051 }
0x21af   :  { %v2101_v2 = vsub.f32 1.0, %v3052_v49  ;;  %v2107_v20 = vmul.f32 %v3052_v49, %v2005_v53 }
0x21ff   :  { %v2092_v11 = vpop.permute.xlu1 %2091 }
0x2200   :  { %v2094_v22 = vmul.f32 %v3052_v49, %v2092_v11 }
0x2202   :  { %2096 = vrot.lane.b32.xlu0 %v2094_v22, %s3070_s22 }
0x2274   :  { %v2097_v13 = vpop.permute.xlu0 %2096 }
0x2275   :  { %v2099_v15 = vadd.f32 %v2097_v13, %v1778_v8 }
0x2277   :  { %3053 = vtanh.f32 %v2099_v15 }
0x2284   :  { %v3054_v17 = vpop.eup %3053 }
0x2285   :  { %2103 = vrot.lane.b32.xlu1 %v3054_v17, %s3071_s2 }
0x22f7   :  { %v2104_v19 = vpop.permute.xlu1 %2103 }
0x22f8   :  { %v2106_v21 = vmul.f32 %v2104_v19, %v2101_v2 }
0x22fa   :  { %v3727_v3 = vadd.f32 %v2107_v20, %v2106_v21 }
0x22fc   :  { %2110 = vrot.lane.b32.xlu0 %v3727_v3, %s3071_s2 }
0x236e   :  { %v2111_v28 = vpop.permute.xlu0 %2110 }
0x236f   :  { %2113 = vst.msk [vmem:[#allocation2 + $0x10] sm:$0xff] %vm134_vm1, %v2111_v28  ;;  %2934 = vmatmul.mubr.msk.f32.vlgmr.msra.gmra.mxu1 %vm134_vm1, %v2111_v28 }
0x2370   :  { %2948 = vmatpush3.msra.mxu1 %v2328_v25  ;;  %2955 = vmatprep.mubr.msk.f32.mxu1 %vm3068_vm0, %v3067_v0 }
0x2371   :  { %2949 = vmatprep.subr.mxu1 %v3067_v0 }
0x2372   :  { %2950 = vmatpush3.msra.mxu1 %v2327_v30 }
0x2373   :  { %2951 = vmatprep.subr.mxu1 %v3067_v0 }
0x2374   :  { %2952 = vmatpush3.msra.mxu1 %v2326_v31 }
0x2375   :  { %2953 = vmatprep.subr.mxu1 %v3067_v0 }
0x2376   :  { %2954 = vmatpush3.msra.mxu1 %v2325_v32  ;;  %v2322_v35 = vld [vmem:[#allocation2 + $0x10] sm:$0xff] }
0x2377   :  { %2956 = vmatmul.mubr.msk.f32.vlgmr.msra.gmra.mxu1 %vm134_vm1, %v2320_v33 }
0x2378   :  { %2958 = vmatprep.mubr.msk.f32.mxu1 %vm3068_vm0, %v3067_v0 }
0x237b   :  { %2959 = vmatmul.mubr.msk.f32.gmra.mxu1 %vm134_vm1, %v2321_v34 }
0x237c   :  { %2961 = vmatprep.mubr.msk.f32.mxu1 %vm3068_vm0, %v3067_v0 }
0x237f   :  { %2962 = vmatmul.mubr.msk.f32.gmra.mxu1 %vm134_vm1, %v2322_v35 }
0x2380   :  { %2964 = vmatprep.mubr.msk.f32.mxu1 %vm3068_vm0, %v3067_v0 }
0x242f   :  { %v2182_v16 = vpop.f32.mrf.mxu1 }
0x2430   :  { %v2183_v36 = vadd.f32 %v3644_v61, %v2182_v16 }
0x2431   :  { %v2935_v23 = vpop.f32.mrf.mxu1 }
0x2432   :  { %2194 = vrot.lane.b32.xlu1 %v2183_v36, %s3070_s22  ;;  %v2186_v44 = vadd.f32 %v2183_v36, %v1783_v43 }
0x2434   :  { %v2527_v45 = vmul.f32 -1.442695, %v2186_v44 }
0x2436   :  { %3055 = vpow2.f32 %v2527_v45 }
0x2437   :  { %v2417_v24 = vpop.f32.mrf.mxu1 }
0x2438   :  { %v2418_v38 = vadd.f32 %v3768_v37, %v2417_v24 }
0x2439   :  { %v2957_v26 = vpop.f32.mrf.mxu1 }
0x243a   :  { %2442 = vst [vmem:[%s3824_s15 + $0x8] sm:$0xff] %v2418_v38 }
0x243b   :  { %v2422_v39 = vpop.f32.mrf.mxu1 }
0x243c   :  { %v2423_v40 = vadd.f32 %v3768_v37, %v2422_v39 }
0x243d   :  { %v2960_v29 = vpop.f32.mrf.mxu1 }
0x243e   :  { %2443 = vst [vmem:[%s3824_s15 + $0x10] sm:$0xff] %v2423_v40 }
0x243f   :  { %v2427_v41 = vpop.f32.mrf.mxu1 }
0x2440   :  { %v2428_v42 = vadd.f32 %v3768_v37, %v2427_v41 }
0x2441   :  { %v2963_v12 = vpop.f32.mrf.mxu1 }
0x2442   :  { %2444 = vst [vmem:[%s3824_s15 + $0x18] sm:$0xff] %v2428_v42 }
0x2443   :  { %v3056_v18 = vpop.eup %3055 }
0x2444   :  { %v2190_v46 = vadd.f32 1.0, %v3056_v18 }
0x2446   :  { %3057 = vrcp.f32 %v2190_v46 }
0x2453   :  { %v3058_v50 = vpop.eup %3057 }
0x2454   :  { %v2204_v55 = vsub.f32 1.0, %v3058_v50  ;;  %v2210_v57 = vmul.f32 %v3058_v50, %v3727_v3 }
0x24a4   :  { %v2195_v14 = vpop.permute.xlu1 %2194 }
0x24a5   :  { %v2197_v51 = vmul.f32 %v3058_v50, %v2195_v14 }
0x24a7   :  { %2199 = vrot.lane.b32.xlu0 %v2197_v51, %s3070_s22 }
0x2519   :  { %v2200_v52 = vpop.permute.xlu0 %2199 }
0x251a   :  { %v2202_v53 = vadd.f32 %v2200_v52, %v1783_v43 }
0x251c   :  { %3059 = vtanh.f32 %v2202_v53 }
0x2529   :  { %v3060_v54 = vpop.eup %3059 }
0x252a   :  { %2206 = vrot.lane.b32.xlu1 %v3060_v54, %s3071_s2 }
0x259c   :  { %v2207_v56 = vpop.permute.xlu1 %2206 }
0x259d   :  { %v2209_v58 = vmul.f32 %v2207_v56, %v2204_v55 }
0x259f   :  { %v2211_v59 = vadd.f32 %v2210_v57, %v2209_v58 }
0x25a1   :  { %2213 = vrot.lane.b32.xlu0 %v2211_v59, %s3071_s2 }
0x2613   :  { %v2214_v60 = vpop.permute.xlu0 %2213 }
0x2614   :  { %2216 = vst.msk [vmem:[#allocation2 + $0x18] sm:$0xff] %vm134_vm1, %v2214_v60  ;;  %2945 = vmatmul.mubr.msk.f32.vlgmr.msra.gmra.mxu0 %vm134_vm1, %v2214_v60 }
0x261b   :  { %v2323_v27 = vld [vmem:[#allocation2 + $0x18] sm:$0xff] }
0x261c   :  { %2965 = vmatmul.mubr.msk.f32.gmra.mxu1 %vm134_vm1, %v2323_v27 }
0x261d   :  { %2967 = vmatprep.mubr.msk.f32.mxu1 %vm3068_vm0, %v3067_v0 }
0x26d4   :  { %v2285_v62 = vpop.f32.mrf.mxu0 }
0x26d5   :  { %v2286_v47 = vadd.f32 %v3644_v61, %v2285_v62 }
0x26d6   :  { %v2946_v63 = vpop.f32.mrf.mxu0 }
0x26d7   :  { %2297 = vrot.lane.b32.xlu1 %v2286_v47, %s3070_s22  ;;  %v2289_v48 = vadd.f32 %v2286_v47, %v1788_v7 }
0x26d9   :  { %v2529_v9 = vmul.f32 -1.442695, %v2289_v48 }
0x26db   :  { %3061 = vpow2.f32 %v2529_v9 }
0x26dc   :  { %v2432_v4 = vpop.f32.mrf.mxu1 }
0x26dd   :  { %v2433_v5 = vadd.f32 %v3768_v37, %v2432_v4 }
0x26de   :  { %v2966_v8 = vpop.f32.mrf.mxu1 }
0x26df   :  { %2445 = vst [vmem:[%s3824_s15 + $0x20] sm:$0xff] %v2433_v5 }
0x26e8   :  { %v3062_v0 = vpop.eup %3061 }
0x26e9   :  { %v2293_v6 = vadd.f32 1.0, %v3062_v0 }
0x26eb   :  { %3063 = vrcp.f32 %v2293_v6 }
0x26f8   :  { %v3064_v61 = vpop.eup %3063 }
0x26f9   :  { %v2307_v17 = vsub.f32 1.0, %v3064_v61  ;;  %v2313_v1 = vmul.f32 %v3064_v61, %v2211_v59 }
0x2749   :  { %v2298_v49 = vpop.permute.xlu1 %2297 }
0x274a   :  { %v2300_v11 = vmul.f32 %v3064_v61, %v2298_v49 }
0x274c   :  { %2302 = vrot.lane.b32.xlu0 %v2300_v11, %s3070_s22 }
0x27be   :  { %v2303_v22 = vpop.permute.xlu0 %2302 }
0x27bf   :  { %v2305_v13 = vadd.f32 %v2303_v22, %v1788_v7 }
0x27c1   :  { %3065 = vtanh.f32 %v2305_v13 }
0x27ce   :  { %v3066_v15 = vpop.eup %3065 }
0x27cf   :  { %2309 = vrot.lane.b32.xlu1 %v3066_v15, %s3071_s2 }
0x2841   :  { %v2310_v2 = vpop.permute.xlu1 %2309 }
0x2842   :  { %v2312_v10 = vmul.f32 %v2310_v2, %v2307_v17 }
0x2844   :  { %v2314_v19 = vadd.f32 %v2313_v1, %v2312_v10 }
0x2846   :  { %2316 = vrot.lane.b32.xlu0 %v2314_v19, %s3071_s2 }
0x28b8   :  { %v2317_v20 = vpop.permute.xlu0 %2316 }
0x28b9   :  { %2319 = vst.msk [vmem:[#allocation2 + $0x20] sm:$0xff] %vm134_vm1, %v2317_v20 }
0x28c0   :  { %v2324_v21 = vld [vmem:[#allocation2 + $0x20] sm:$0xff] }
0x28c1   :  { %2968 = vmatmul.mubr.msk.f32.gmra.mxu1 %vm134_vm1, %v2324_v21 }
0x2981   :  { %v2437_v3 = vpop.f32.mrf.mxu1 }
0x2982   :  { %v2438_v25 = vadd.f32 %v3768_v37, %v2437_v3 }
0x2983   :  { %v2969_v28 = vpop.f32.mrf.mxu1 }
0x2984   :  { %2446 = vst [vmem:[%s3824_s15 + $0x28] sm:$0xff] %v2438_v25 }

</bundles_post_ra>
